<compile_context>
chip_gen: v7x
topology: tpu7x:2x2x1
jax: 0.10.0
libtpu: 0.0.40
codegen_flags: <defaults>
</compile_context>

<pallas_src>
import functools

import numpy as np
import jax
import jax.numpy as jnp
from jax.experimental import pallas as pl
from jax.experimental.pallas import tpu as pltpu

LANE = 128
VMEM_LIMIT = 56 * 1024 * 1024      # safe on v5e/v6e (128 MiB phys) and v7x (64 MiB phys)


def _rup(c, m=LANE):
    return ((c + m - 1) // m) * m


def _row_tile(rows):
    for t in (1024, 512, 256, 128, 64, 32, 16, 8):
        if rows % t == 0:
            return t
    return rows


# ----------------------------------------------------------------------------- Pallas kernels

def _conv3x3_kernel(x_ref, w_ref, b_ref, o_ref, *, wp, hc, cin, relu_in):
    # x_ref: (1, L, Cin) bf16 -- whole zero-padded image, rows flattened (resident across chunks)
    # w_ref: (9*Cin, Cout) bf16 im2col weights;  b_ref: (1, Cout) f32
    # o_ref: (1, hc*wp, Cout) -- one row chunk (2 junk cols per row, stripped by the wrapper)
    rows = hc * wp
    win = rows + 2 * wp + 2
    base = pl.program_id(1) * rows
    if rows % 8 == 0:
        base = pl.multiple_of(base, 8)
    xw = x_ref[0, pl.ds(base, win), :]
    if relu_in:
        xw = jnp.maximum(xw, 0)                       # relu applied once per chunk (not 9x)
    acc = None
    for dy in range(3):                                # 9 accumulated per-tap matmuls
        for dx in range(3):
            t = dy * 3 + dx
            off = dy * wp + dx
            part = jnp.dot(xw[off:off + rows, :],
                           w_ref[t * cin:(t + 1) * cin, :],
                           preferred_element_type=jnp.float32)
            acc = part if acc is None else acc + part
    o_ref[0, :, :] = (acc + b_ref[...]).astype(o_ref.dtype)


def _dense_kernel(x_ref, w_ref, b_ref, o_ref):
    # out = x @ w + b   (row-tiled dense matmul, used for the compact first RGB conv)
    acc = jnp.dot(x_ref[...], w_ref[...], preferred_element_type=jnp.float32) + b_ref[...]
    o_ref[...] = acc.astype(o_ref.dtype)


def _sc_add_kernel(h_ref, s_ref, w_ref, b_ref, o_ref):
    # out = h + (s @ w_sc + b_sc)   (fused 1x1 shortcut conv + residual add)
    sc = jnp.dot(s_ref[...], w_ref[...], preferred_element_type=jnp.float32) + b_ref[...]
    o_ref[...] = (h_ref[...].astype(jnp.float32) + sc).astype(o_ref.dtype)


def _add_kernel(a_ref, b_ref, o_ref):
    o_ref[...] = (a_ref[...].astype(jnp.float32)
                  + b_ref[...].astype(jnp.float32)).astype(o_ref.dtype)


def _img_head_kernel(x_ref, w_ref, b_ref, o_ref):
    # x: (N, H*W, C) -> out = (sum_hw relu(x)) @ w + b
    x = jnp.maximum(x_ref[...].astype(jnp.float32), 0.0)
    s = jnp.sum(x, axis=1)                                          # (N, C)
    o_ref[...] = jnp.dot(s, w_ref[...], preferred_element_type=jnp.float32) + b_ref[...]


def _obj_head_kernel(x_ref, w_ref, b_ref, e_ref, o_ref):
    # x: (B, H*W, C); feat = sum_hw relu(x);  out = feat @ w + b + sum(emb * feat, -1, keepdims)
    x = jnp.maximum(x_ref[...].astype(jnp.float32), 0.0)
    feat = jnp.sum(x, axis=1)                                       # (B, C)
    lin = jnp.dot(feat, w_ref[...], preferred_element_type=jnp.float32) + b_ref[...]
    proj = jnp.sum(e_ref[...] * feat, axis=1, keepdims=True)
    o_ref[...] = lin + proj


def _roi_matmul_kernel(bidx_ref, m_ref, f_ref, o_ref):
    # per-ROI bilinear interpolation as a matmul: (P, HW) @ (HW, C); feature block picked by
    # scalar-prefetched batch index (no HBM gather of R feature-map copies).
    del bidx_ref
    o_ref[0] = jnp.dot(m_ref[0], f_ref[0],
                       preferred_element_type=jnp.float32).astype(o_ref.dtype)


# ----------------------------------------------------------------------------- kernel wrappers

def conv3x3_sn(x, p, relu_in=False):
    """3x3 stride-1 pad-1 conv (SN baked in).  x: (N,H,W,Cin) bf16, Cin lane-padded."""
    n, h, w, cin = x.shape
    cout = p["w"].shape[1]
    wp = w + 2
    L = (h + 3) * wp
    hc = 16 if (h > 16 and h % 16 == 0) else h
    nch = h // hc
    rows = hc * wp
    M = h * wp
    # TODO(synk): input block is still the whole padded image per batch element; halo'd row-chunk
    # input blocking (pl.Element / manual DMA) would shrink VMEM further at production sizes.
    xf = jnp.pad(x, ((0, 0), (1, 2), (1, 1), (0, 0))).reshape(n, L, cin)
    kern = functools.partial(_conv3x3_kernel, wp=wp, hc=hc, cin=cin, relu_in=relu_in)
    out = pl.pallas_call(
        kern,
        out_shape=jax.ShapeDtypeStruct((n, M, cout), x.dtype),
        grid=(n, nch),
        in_specs=[
            pl.BlockSpec((1, L, cin), lambda i, j: (i, 0, 0)),
            pl.BlockSpec((9 * cin, cout), lambda i, j: (0, 0)),
            pl.BlockSpec((1, cout), lambda i, j: (0, 0)),
        ],
        out_specs=pl.BlockSpec((1, rows, cout), lambda i, j: (i, j, 0)),
        compiler_params=pltpu.CompilerParams(
            dimension_semantics=("parallel", "parallel"),
            vmem_limit_bytes=VMEM_LIMIT),
    )(xf, p["w"], p["b"])
    # strip the 2 junk columns per row (fused by XLA into the consumer's copy)
    return out.reshape(n, h, wp, cout)[:, :, :w, :]


def dense_rows(x2d, w, b, out_dtype):
    """out = x2d @ w + b, row-tiled."""
    rows, cin = x2d.shape
    cout = w.shape[1]
    tm = _row_tile(rows)
    return pl.pallas_call(
        _dense_kernel,
        out_shape=jax.ShapeDtypeStruct((rows, cout), out_dtype),
        grid=(rows // tm,),
        in_specs=[pl.BlockSpec((tm, cin), lambda i: (i, 0)),
                  pl.BlockSpec((cin, cout), lambda i: (0, 0)),
                  pl.BlockSpec((1, cout), lambda i: (0, 0))],
        out_specs=pl.BlockSpec((tm, cout), lambda i: (i, 0)),
        compiler_params=pltpu.CompilerParams(dimension_semantics=("parallel",),
                                             vmem_limit_bytes=VMEM_LIMIT),
    )(x2d, w, b)


def conv3x3_first(x, p):
    """First RGB conv: XLA-side 27-channel im2col (padded to 128) + plain matmul kernel.

    Avoids padding Cin 3->128 inside the im2col K (would be 9x wasted MXU passes).
    x: (N,H,W,3) bf16.
    """
    n, h, w, c = x.shape
    xp = jnp.pad(x, ((0, 0), (1, 1), (1, 1), (0, 0)))
    cols = jnp.concatenate([xp[:, dy:dy + h, dx:dx + w, :]
                            for dy in range(3) for dx in range(3)], axis=-1)    # (N,H,W,27)
    kp, coutp = p["w"].shape
    cols = jnp.pad(cols, ((0, 0), (0, 0), (0, 0), (0, kp - 9 * c)))
    out = dense_rows(cols.reshape(n * h * w, kp).astype(jnp.bfloat16), p["w"], p["b"],
                     jnp.bfloat16)
    return out.reshape(n, h, w, coutp)


def fused_shortcut_add(h, sc_in, p):
    """out = h + conv1x1(sc_in).  Row-tiled parallel grid, lane-dense blocks."""
    n, hh, ww, c = h.shape
    cin = sc_in.shape[-1]
    rows = n * hh * ww
    tm = _row_tile(rows)
    out = pl.pallas_call(
        _sc_add_kernel,
        out_shape=jax.ShapeDtypeStruct((rows, c), h.dtype),
        grid=(rows // tm,),
        in_specs=[
            pl.BlockSpec((tm, c), lambda i: (i, 0)),
            pl.BlockSpec((tm, cin), lambda i: (i, 0)),
            pl.BlockSpec((cin, c), lambda i: (0, 0)),
            pl.BlockSpec((1, c), lambda i: (0, 0)),
        ],
        out_specs=pl.BlockSpec((tm, c), lambda i: (i, 0)),
        compiler_params=pltpu.CompilerParams(dimension_semantics=("parallel",),
                                             vmem_limit_bytes=VMEM_LIMIT),
    )(h.reshape(rows, c), sc_in.reshape(rows, cin), p["w"], p["b"])
    return out.reshape(n, hh, ww, c)


def pallas_add(a, b):
    n, hh, ww, c = a.shape
    rows = n * hh * ww
    tm = _row_tile(rows)
    out = pl.pallas_call(
        _add_kernel,
        out_shape=jax.ShapeDtypeStruct((rows, c), a.dtype),
        grid=(rows // tm,),
        in_specs=[pl.BlockSpec((tm, c), lambda i: (i, 0)),
                  pl.BlockSpec((tm, c), lambda i: (i, 0))],
        out_specs=pl.BlockSpec((tm, c), lambda i: (i, 0)),
        compiler_params=pltpu.CompilerParams(dimension_semantics=("parallel",)),
    )(a.reshape(rows, c), b.reshape(rows, c))
    return out.reshape(n, hh, ww, c)


def img_head(x, p):
    """Fused relu + spatial sum + l8 linear.  x: (N,H,W,C) -> (N,1)."""
    n, hh, ww, c = x.shape
    return pl.pallas_call(
        _img_head_kernel,
        out_shape=jax.ShapeDtypeStruct((n, 1), jnp.float32),
    )(x.reshape(n, hh * ww, c), p["w"], p["b"])


def obj_head(x, p, emb):
    """Fused relu + spatial sum + l_obj linear + embedding projection.  x: (B,H,W,C) -> (B,1)."""
    b, hh, ww, c = x.shape
    return pl.pallas_call(
        _obj_head_kernel,
        out_shape=jax.ShapeDtypeStruct((b, 1), jnp.float32),
    )(x.reshape(b, hh * ww, c), p["w"], p["b"], emb)


# ----------------------------------------------------------------------------- JAX / host glue

def avg_pool2(x):
    # F.avg_pool2d(x, 2) equivalent (NHWC).
    # TODO(synk): could be fused into the producing conv's epilogue to cut output HBM traffic 4x.
    n, h, w, c = x.shape
    y = x.astype(jnp.float32).reshape(n, h // 2, 2, w // 2, 2, c).mean(axis=(2, 4))
    return y.astype(x.dtype)


def _roi_align_matrices(rois, fh, fw, spatial_scale, out_size=8, sampling_ratio=0):
    """Per-ROI bilinear interpolation matrices (torchvision aligned=False semantics).

    Host numpy (tiny, data-dependent sample counts); returns M: (R, out*out, fh*fw) f32 and
    batch indices (R,) int32 so that out[r] = M[r] @ feat[bidx[r]].reshape(fh*fw, C).
    """
    R = rois.shape[0]
    M = np.zeros((R, out_size * out_size, fh * fw), np.float32)
    bidx = np.zeros((R,), np.int32)
    for r in range(R):
        bidx[r] = int(round(rois[r, 0]))
        rsw = rois[r, 1] * spatial_scale
        rsh = rois[r, 2] * spatial_scale
        rew = rois[r, 3] * spatial_scale
        reh = rois[r, 4] * spatial_scale
        roi_w = max(rew - rsw, 1.0)
        roi_h = max(reh - rsh, 1.0)
        bin_h = roi_h / out_size
        bin_w = roi_w / out_size
        gh = sampling_ratio if sampling_ratio > 0 else int(np.ceil(roi_h / out_size))
        gw = sampling_ratio if sampling_ratio > 0 else int(np.ceil(roi_w / out_size))
        norm = 1.0 / float(gh * gw)
        for ph in range(out_size):
            for pw in range(out_size):
                p = ph * out_size + pw
                for iy in range(gh):
                    y = rsh + ph * bin_h + (iy + 0.5) * bin_h / gh
                    for ix in range(gw):
                        x = rsw + pw * bin_w + (ix + 0.5) * bin_w / gw
                        if y < -1.0 or y > fh or x < -1.0 or x > fw:
                            continue
                        yy = max(y, 0.0)
                        xx = max(x, 0.0)
                        y_low = int(np.floor(yy))
                        x_low = int(np.floor(xx))
                        if y_low >= fh - 1:
                            y_low = y_high = fh - 1
                            yy = float(y_low)
                        else:
                            y_high = y_low + 1
                        if x_low >= fw - 1:
                            x_low = x_high = fw - 1
                            xx = float(x_low)
                        else:
                            x_high = x_low + 1
                        ly, lx = yy - y_low, xx - x_low
                        hy, hx = 1.0 - ly, 1.0 - lx
                        M[r, p, y_low * fw + x_low] += norm * hy * hx
                        M[r, p, y_low * fw + x_high] += norm * hy * lx
                        M[r, p, y_high * fw + x_low] += norm * ly * hx
                        M[r, p, y_high * fw + x_high] += norm * ly * lx
    return M, bidx


def roi_align(feat, rois_np, spatial_scale, out_size=8):
    """ROIAlign(out,out), sampling_ratio=0, aligned=False, as a batched Pallas matmul.

    Scalar-prefetched batch indices drive the feature BlockSpec -> no per-ROI HBM gather.
    """
    n, fh, fw, c = feat.shape
    R = rois_np.shape[0]
    if R == 0:
        return jnp.zeros((0, out_size, out_size, c), feat.dtype)
    M, bidx = _roi_align_matrices(rois_np, fh, fw, spatial_scale, out_size, 0)
    P = out_size * out_size
    HW = fh * fw
    feat_flat = feat.reshape(n, HW, c)
    out = pl.pallas_call(
        _roi_matmul_kernel,
        out_shape=jax.ShapeDtypeStruct((R, P, c), feat.dtype),
        grid_spec=pltpu.PrefetchScalarGridSpec(
            num_scalar_prefetch=1, grid=(R,),
            in_specs=[
                pl.BlockSpec((1, P, HW), lambda i, bidx: (i, 0, 0)),
                pl.BlockSpec((1, HW, c), lambda i, bidx: (bidx[i], 0, 0)),
            ],
            out_specs=pl.BlockSpec((1, P, c), lambda i, bidx: (i, 0, 0))),
        compiler_params=pltpu.CompilerParams(dimension_semantics=("arbitrary",)),
    )(jnp.asarray(bidx, jnp.int32), jnp.asarray(M).astype(jnp.bfloat16), feat_flat)
    return out.reshape(R, out_size, out_size, c)


# ----------------------------------------------------------------------------- parameters

def _spectral_normalize(w, n_iter=50, eps=1e-4):
    w = np.asarray(w, dtype=np.float64)
    mat = w.reshape(w.shape[0], -1)
    u = np.full((mat.shape[0],), 1.0)
    u /= np.linalg.norm(u) + eps
    v = np.zeros((mat.shape[1],))
    for _ in range(n_iter):
        v = mat.T @ u
        v /= np.linalg.norm(v) + eps
        u = mat @ v
        u /= np.linalg.norm(u) + eps
    sigma = float(u @ mat @ v)
    return (w / sigma).astype(np.float32)


def _init_conv3(key, cin, cout):
    cinp, coutp = _rup(cin), _rup(cout)
    kw, kb = jax.random.split(key)
    w = np.asarray(jax.random.normal(kw, (cout, cin, 3, 3), jnp.float32)) / np.sqrt(cin * 9.0)
    w = _spectral_normalize(w)                         # (cout, cin, 3, 3)
    w = np.transpose(w, (2, 3, 1, 0))                  # (3, 3, cin, cout)
    wp = np.zeros((3, 3, cinp, coutp), np.float32)
    wp[:, :, :cin, :cout] = w
    b = np.zeros((1, coutp), np.float32)
    b[0, :cout] = np.asarray(jax.random.normal(kb, (cout,), jnp.float32)) * 0.01
    return {"w": jnp.asarray(wp.reshape(9 * cinp, coutp), jnp.bfloat16),
            "b": jnp.asarray(b)}


def _init_conv3_first(key, cin, cout):
    # Compact im2col layout for small-Cin first layer: K = 9*cin (=27) padded to one lane group.
    coutp = _rup(cout)
    kp = _rup(9 * cin)
    kw, kb = jax.random.split(key)
    w = np.asarray(jax.random.normal(kw, (cout, cin, 3, 3), jnp.float32)) / np.sqrt(cin * 9.0)
    w = _spectral_normalize(w)
    w = np.transpose(w, (2, 3, 1, 0)).reshape(9 * cin, cout)   # (dy,dx,c) row order
    wp = np.zeros((kp, coutp), np.float32)
    wp[:9 * cin, :cout] = w
    b = np.zeros((1, coutp), np.float32)
    b[0, :cout] = np.asarray(jax.random.normal(kb, (cout,), jnp.float32)) * 0.01
    return {"w": jnp.asarray(wp, jnp.bfloat16), "b": jnp.asarray(b)}


def _init_conv1(key, cin, cout):
    cinp, coutp = _rup(cin), _rup(cout)
    kw, kb = jax.random.split(key)
    w = np.asarray(jax.random.normal(kw, (cout, cin, 1, 1), jnp.float32)) / np.sqrt(float(cin))
    w = _spectral_normalize(w)[:, :, 0, 0]             # (cout, cin)
    wp = np.zeros((cinp, coutp), np.float32)
    wp[:cin, :cout] = w.T
    b = np.zeros((1, coutp), np.float32)
    b[0, :cout] = np.asarray(jax.random.normal(kb, (cout,), jnp.float32)) * 0.01
    return {"w": jnp.asarray(wp, jnp.bfloat16), "b": jnp.asarray(b)}


def _init_linear(key, cin, cout=1):
    cinp = _rup(cin)
    kw, kb = jax.random.split(key)
    w = np.asarray(jax.random.normal(kw, (cout, cin), jnp.float32)) / np.sqrt(float(cin))
    w = _spectral_normalize(w)
    wp = np.zeros((cinp, cout), np.float32)
    wp[:cin, :] = w.T
    b = np.asarray(jax.random.normal(kb, (1, cout), jnp.float32)) * 0.01
    return {"w": jnp.asarray(wp), "b": jnp.asarray(b)}


def _init_embedding(key, num_classes, dim):
    dimp = _rup(dim)
    w = _spectral_normalize(np.asarray(jax.random.normal(key, (num_classes, dim), jnp.float32)))
    wp = np.zeros((num_classes, dimp), np.float32)
    wp[:, :dim] = w
    return jnp.asarray(wp)


def _init_opt_block(key, cin, cout):
    k1, k2, k3 = jax.random.split(key, 3)
    return {"conv1": _init_conv3_first(k1, cin, cout),
            "conv2": _init_conv3(k2, cout, cout),
            "c_sc": _init_conv1(k3, cin, cout)}


def _init_res_block(key, cin, cout, downsample):
    k1, k2, k3 = jax.random.split(key, 3)
    p = {"conv1": _init_conv3(k1, cin, cout),
         "conv2": _init_conv3(k2, cout, cout)}
    if cin != cout or downsample:
        p["c_sc"] = _init_conv1(k3, cin, cout)
    return p


def init_params(key, ch=8, num_classes=81):
    ks = jax.random.split(key, 13)
    return {
        "block1": _init_opt_block(ks[0], 3, ch),
        "block2": _init_res_block(ks[1], ch, ch * 2, True),
        "block3": _init_res_block(ks[2], ch * 2, ch * 4, True),
        "block4": _init_res_block(ks[3], ch * 4, ch * 8, True),
        "block5": _init_res_block(ks[4], ch * 8, ch * 8, True),
        "block6": _init_res_block(ks[5], ch * 8, ch * 16, True),
        "block7": _init_res_block(ks[6], ch * 16, ch * 16, False),
        "l8": _init_linear(ks[7], ch * 16, 1),
        "block_obj4": _init_res_block(ks[8], ch * 4, ch * 8, False),
        "block_obj5": _init_res_block(ks[9], ch * 8, ch * 8, False),
        "block_obj6": _init_res_block(ks[10], ch * 8, ch * 16, True),
        "l_obj": _init_linear(ks[11], ch * 16, 1),
        "l_y": _init_embedding(ks[12], num_classes, ch * 16),
    }


# ----------------------------------------------------------------------------- blocks / model

def optimized_block(x_rgb, p, downsample=True):
    # x_rgb: (N,H,W,3) bf16 (real channels, unpadded)
    h = conv3x3_first(x_rgb, p["conv1"])
    h = conv3x3_sn(h, p["conv2"], relu_in=True)        # relu fused onto conv1's output
    if downsample:
        h = avg_pool2(h)
        sc_in = avg_pool2(x_rgb)
    else:
        sc_in = x_rgb
    cinp = p["c_sc"]["w"].shape[0]
    sc_in = jnp.pad(sc_in, ((0, 0), (0, 0), (0, 0), (0, cinp - sc_in.shape[-1])))
    return fused_shortcut_add(h, sc_in, p["c_sc"])


def res_block(x, p, downsample):
    h = conv3x3_sn(x, p["conv1"], relu_in=True)
    h = conv3x3_sn(h, p["conv2"], relu_in=True)
    if downsample:
        h = avg_pool2(h)
    if "c_sc" in p:
        # 1x1 conv commutes exactly with mean pooling: avgpool(c_sc(x)) == c_sc(avgpool(x)).
        sc_in = avg_pool2(x) if downsample else x
        return fused_shortcut_add(h, sc_in, p["c_sc"])
    return pallas_add(h, x)


def resnet_discriminator256_forward(params, images_nchw, labels_np, bbox5_np):
    """images: (N,3,H,W);  labels_np: (b,) numpy int;  bbox5_np: (b,5) numpy [bidx,x1,y1,x2,y2]."""
    x = jnp.transpose(images_nchw, (0, 2, 3, 1)).astype(jnp.bfloat16)      # NHWC, 3 channels

    x = optimized_block(x, params["block1"], downsample=True)
    x = res_block(x, params["block2"], True)
    x1 = res_block(x, params["block3"], True)
    x2 = res_block(x1, params["block4"], True)
    x = res_block(x2, params["block5"], True)
    x = res_block(x, params["block6"], True)
    x = res_block(x, params["block7"], False)
    out_im = img_head(x, params["l8"])                                     # (N, 1)

    s_mask = ((bbox5_np[:, 3] - bbox5_np[:, 1] < 64.0)
              & (bbox5_np[:, 4] - bbox5_np[:, 2] < 64.0))
    bbox_l, bbox_s = bbox5_np[~s_mask], bbox5_np[s_mask]
    y_l, y_s = labels_np[~s_mask], labels_np[s_mask]

    obj_feat_s = res_block(x1, params["block_obj4"], False)
    obj_feat_s = res_block(obj_feat_s, params["block_obj5"], False)
    roi_s = roi_align(obj_feat_s, bbox_s, 1.0 / 8.0)

    obj_feat_l = res_block(x2, params["block_obj5"], False)
    roi_l = roi_align(obj_feat_l, bbox_l, 1.0 / 16.0)

    obj_feat = jnp.concatenate([roi_l, roi_s], axis=0)                     # (b, 8, 8, C)
    y_cat = np.concatenate([y_l, y_s], axis=0)
    obj_feat = res_block(obj_feat, params["block_obj6"], True)             # (b, 4, 4, C)
    emb = params["l_y"][jnp.asarray(y_cat)]                                # (b, C) gather glue
    out_obj = obj_head(obj_feat, params["l_obj"], emb)                     # (b, 1)
    return out_im, out_obj


def combine_discriminator256_forward(params, images_nchw, bbox, label):
    # TODO(synk): bbox/label filtering and ROI bilinear-weight construction are data-dependent-
    # shape host work (tiny numpy) that syncs the device once per forward; all conv/matmul compute
    # runs on device in Pallas kernels.
    n, num_o = label.shape
    size = images_nchw.shape[2]
    bbox_np = np.asarray(jax.device_get(bbox), np.float64)
    label_np = np.asarray(jax.device_get(label))
    idx = np.broadcast_to(np.arange(n, dtype=np.float64).reshape(n, 1, 1), (n, num_o, 1))
    x1c = bbox_np[:, :, 0]
    y1c = bbox_np[:, :, 1]
    x2c = bbox_np[:, :, 2] + bbox_np[:, :, 0]
    y2c = bbox_np[:, :, 3] + bbox_np[:, :, 1]
    bb = np.stack([x1c, y1c, x2c, y2c], axis=2) * float(size)
    bbox5 = np.concatenate([idx, bb], axis=2).reshape(-1, 5)
    labels = label_np.reshape(-1)
    keep = labels != 0
    return resnet_discriminator256_forward(params, images_nchw, labels[keep], bbox5[keep])


# ----------------------------------------------------------------------------- main

if __name__ == "__main__":
    ch = 8            # scaled-down channel multiplier (reference uses ch=64)
    num_classes = 81
    N, num_o, size = 2, 4, 64

    key = jax.random.PRNGKey(0)
    k_param, k_img = jax.random.split(key)
    params = init_params(k_param, ch=ch, num_classes=num_classes)

    images = jax.random.normal(k_img, (N, 3, size, size), jnp.float32)
    # bbox format (per object): [x, y, w, h] in normalized coords; third box of batch 0 is "large".
    bbox = jnp.array(
        [[[0.10, 0.15, 0.30, 0.25],
          [0.05, 0.05, 0.50, 0.40],
          [0.00, 0.00, 1.20, 1.10],
          [0.40, 0.35, 0.20, 0.30]],
         [[0.20, 0.10, 0.25, 0.35],
          [0.10, 0.60, 0.30, 0.20],
          [0.55, 0.15, 0.35, 0.45],
          [0.05, 0.05, 0.60, 0.55]]], jnp.float32)
    label = jnp.array([[1, 0, 5, 2],
                       [3, 7, 0, 4]], jnp.int32)

    d_out_img, d_out_obj = combine_discriminator256_forward(params, images, bbox, label)
    jax.block_until_ready((d_out_img, d_out_obj))

    assert d_out_img.shape == (N, 1)
    assert d_out_obj.shape == (6, 1)          # 6 boxes survive the label != 0 filter
    assert bool(jnp.all(jnp.isfinite(d_out_img))) and bool(jnp.all(jnp.isfinite(d_out_obj)))
    print("KERNEL_OK")
</pallas_src>

<mosaic_0001>
module attributes {stable_mosaic.version = 11 : i64} {
  func.func @_dense_kernel(%arg0: i32, %arg1: memref<1024x128xbf16, #tpu.memory_space<vmem>>, %arg2: memref<128x128xbf16, #tpu.memory_space<vmem>>, %arg3: memref<1x128xf32, #tpu.memory_space<vmem>>, %arg4: memref<1024x128xbf16, #tpu.memory_space<vmem>>) attributes {dimension_semantics = [#tpu.dimension_semantics<parallel>], iteration_bounds = array<i64: 8>, scalar_prefetch = 0 : i64, scratch_operands = 0 : i64, tpu.core_type = #tpu.core_type<tc>, window_params = [{transform_indices = @transform_0, window_bounds = array<i64: 1024, 128>}, {pipeline_mode = #tpu.pipeline_mode<synchronous>, transform_indices = @transform_1, window_bounds = array<i64: 128, 128>}, {pipeline_mode = #tpu.pipeline_mode<synchronous>, transform_indices = @transform_2, window_bounds = array<i64: 1, 128>}, {transform_indices = @transform_3, window_bounds = array<i64: 1024, 128>}]} {
    %c0 = arith.constant 0 : index
    %c0_0 = arith.constant 0 : index
    %0 = vector.load %arg1[%c0, %c0_0] : memref<1024x128xbf16, #tpu.memory_space<vmem>>, vector<1024x128xbf16>
    %c0_1 = arith.constant 0 : index
    %c0_2 = arith.constant 0 : index
    %1 = vector.load %arg2[%c0_1, %c0_2] : memref<128x128xbf16, #tpu.memory_space<vmem>>, vector<128x128xbf16>
    %cst = arith.constant dense<0.000000e+00> : vector<1024x128xf32>
    %2 = tpu.matmul %0, %1, %cst {dimension_numbers = #tpu.dot_dimension_numbers<[1], [0], [0], [1], [0, 0, 1, 1], [], []>} : vector<1024x128xbf16>, vector<128x128xbf16>, vector<1024x128xf32> -> vector<1024x128xf32>
    %c0_3 = arith.constant 0 : index
    %c0_4 = arith.constant 0 : index
    %3 = vector.load %arg3[%c0_3, %c0_4] : memref<1x128xf32, #tpu.memory_space<vmem>>, vector<1x128xf32>
    %4 = vector.broadcast %3 : vector<1x128xf32> to vector<1024x128xf32>
    %5 = arith.addf %2, %4 : vector<1024x128xf32>
    %6 = arith.truncf %5 : vector<1024x128xf32> to vector<1024x128xbf16>
    %c0_5 = arith.constant 0 : index
    %c0_6 = arith.constant 0 : index
    %7 = vector.load %arg4[%c0_5, %c0_6] : memref<1024x128xbf16, #tpu.memory_space<vmem>>, vector<1024x128xbf16>
    tpu.vector_store %arg4[%c0_5, %c0_6], %6 {strides = array<i32>} : memref<1024x128xbf16, #tpu.memory_space<vmem>>, vector<1024x128xbf16>,
    return
  }
  func.func @transform_0(%arg0: i32) -> (i32, i32) {
    %c0_i32 = arith.constant 0 : i32
    %c0_i32_0 = arith.constant 0 : i32
    return %arg0, %c0_i32 : i32, i32
  }
  func.func @transform_1(%arg0: i32) -> (i32, i32) {
    %c0_i32 = arith.constant 0 : i32
    %c0_i32_0 = arith.constant 0 : i32
    %c0_i32_1 = arith.constant 0 : i32
    return %c0_i32, %c0_i32_0 : i32, i32
  }
  func.func @transform_2(%arg0: i32) -> (i32, i32) {
    %c0_i32 = arith.constant 0 : i32
    %c0_i32_0 = arith.constant 0 : i32
    %c0_i32_1 = arith.constant 0 : i32
    return %c0_i32, %c0_i32_0 : i32, i32
  }
  func.func @transform_3(%arg0: i32) -> (i32, i32) {
    %c0_i32 = arith.constant 0 : i32
    %c0_i32_0 = arith.constant 0 : i32
    return %arg0, %c0_i32 : i32, i32
  }
}

</mosaic_0001>

<bundles_post_ra>
// kernel: tpu_custom_call.1
= control target key start
LH: loop header
LB: loop body
LE: loop exit
PB: predicated region body
PF: predicated region fallthrough
CT: control target
= control target key end

     0   :  { %8 = vsyncpa [#allocation3], 0  ;;  %s3885_s0 = inlined_call_operand.hbm [shape: bf16[8192,128], index: 0, kind: input, shape index: {}]   ;;  %s3886_s1 = inlined_call_operand.hbm [shape: bf16[128,128], index: 1, kind: input, shape index: {}]   ;;  %s3887_s2 = inlined_call_operand.hbm [shape: f32[1,128], index: 2, kind: input, shape index: {}]   ;;  %s3888_s3 = inlined_call_operand.hbm [shape: bf16[8192,128], index: 3, kind: output, shape index: {}]  }
   0x1   :  { %10 = vsyncpa [#allocation3 + $0x1], 0 }
   0x2   :  { %11 = vsyncpa [#allocation6], 0 }
   0x3   :  { %12 = vsyncpa [#allocation4], 0 }
   0x4   :  { %14 = vsyncpa [#allocation4 + $0x1], 0  ;;  %s3386_s12 = smov 0   ;;  %s3388_s13 = smov 0  }
   0x5   :  { %s3390_s14 = smov 0   ;;  %s3392_s15 = smov 0  }
   0x6 LB: > { %s3407_s16 = sadd.s32 4294967295, %s3356_s15   ;;  %s2093_s17 = sadd.s32 4294967294, %s3356_s15   ;;  %s3356_s15 = sphi %s3392_s15, %s3907_s15   ;;  %s3352_s14 = sphi %s3390_s14, %s3906_s14   ;;  %s3348_s13 = sphi %s3388_s13, %s3905_s13   ;;  %s3344_s12 = sphi %s3386_s12, %s3904_s12  }
   0x7   : > { %p40_p0 = scmp.ne.s32.totalorder %s3348_s13, %s3344_s12  ;;  %p3889_p1 = scmp.eq.s32.totalorder %s3407_s16, 0 }
   0x8   : > { %p112_p3 = scmp.eq.s32.totalorder %s2093_s17, 7  ;;  %p2094_p5 = scmp.ge.s32.totalorder %s3356_s15, 1 }
   0x9   : > { %p3416_p4 = por %p3889_p1, %p40_p0  ;;  %p119_p7 = scmp.lt.s32.totalorder %s3356_s15, 9 }
   0xa   : > { %p3421_p6 = por %p112_p3, %p40_p0  ;;  %s3358_s21 = smov [#allocation5]  }
   0xb   : > { %s3892_s18 = scalar_select %p3416_p4, 1, 0 }
   0xc   : > { %s3893_s19 = scalar_select %p3421_p6, 1, 0 }
   0xd   : > { %p3426_p8 = pnand %p2094_p5, %p119_p7  ;;  %s131_s22 = sshll.u32 %s3358_s21, 4  ;;  %s132_s22 = int_to_ptr.vmem [resolvable:$true] %s131_s22 }
   0xe   : > { %s3359_s24 = smov [#allocation7]   ;;  %s3200_s28 = scalar_lea.hbm %s3886_s1, 1024 }
   0xf   : > { %s3894_s20 = scalar_select %p3426_p8, 1, 0 }
  0x10   : > { %p3069_p9 = pneg %p3426_p8  ;;  %s145_s25 = sshll.u32 %s3359_s24, 4  ;;  %s3438_s25 = int_to_ptr.vmem [resolvable:$true] %s145_s25 }
  0x11   : > { %p3201_p11 = scmp.ne.s32.totalorder %s3886_s1, %s3200_s28  ;;  %p3207_p3 = scmp.lt.u32.totalorder %s3200_s28, %s3886_s1 }
  0x12   : > { %p3434_p10 = pnand %p3069_p9, %p3889_p1 }
  0x14   : > { %p3202_p12 = pneg %p3434_p10 }
  0x16   : > { %p3203_p13 = pnand %p3202_p12, %p3201_p11 }
  0x18   : > { %p3204_p0 = pneg %p3203_p13 }
  0x1a   : > { %p3209_p5 = pnand %p3207_p3, %p3204_p0 }
  0x1c   : > { %3212 = shalt.err (!%p3209_p5)
}
  0x1d   : > { %s3213_s6 = scalar_lea.vmem %s132_s22, 1024  ;;  %p3221_p2 = scmp.lt.s32.totalorder %s132_s22, %s132_s22 }
  0x1e   : > { %p3214_p7 = scmp.ne.s32.totalorder %s132_s22, %s3213_s6  ;;  %p3222_p6 = scmp.lt.s32.totalorder %s3213_s6, %s3213_s6 }
  0x20   : > { %p3216_p9 = pnand %p3214_p7, %p3202_p12  ;;  %p3223_p4 = por %p3222_p6, %p3221_p2 }
  0x22   : > { %p3217_p1 = pneg %p3216_p9 }
  0x24   : > { %p3224_p8 = pnand %p3223_p4, %p3217_p1 }
  0x26   : > { %3227 = shalt.err (!%p3224_p8)
}
  0x27   : > { %s3360_s7 = smov 64   ;;  %s3361_s8 = smov 4  }
  0x28   : > { %3072 = dma.hbm_to_vmem [thread:$0]  (!%p3434_p10), %s3886_s1, 1024, %s132_s22, [#allocation6], %s3360_s7, %s3360_s7, %s3361_s8  }
  0x29   : > { %s3228_s21 = scalar_lea.hbm %s3887_s2, 16 }
  0x2a   : > { %p3229_p1 = scmp.ne.s32.totalorder %s3887_s2, %s3228_s21  ;;  %p3235_p6 = scmp.lt.u32.totalorder %s3228_s21, %s3887_s2 }
  0x2c   : > { %p3231_p2 = pnand %p3229_p1, %p3202_p12 }
  0x2e   : > { %p3232_p4 = pneg %p3231_p2 }
  0x30   : > { %p3237_p8 = pnand %p3235_p6, %p3232_p4 }
  0x32   : > { %3240 = shalt.err (!%p3237_p8)
}
  0x33   : > { %s3241_s22 = scalar_lea.vmem %s3438_s25, 16  ;;  %s3248_s29 = scalar_lea.vmem %s3438_s25, 32 }
  0x34   : > { %p3242_p11 = scmp.ne.s32.totalorder %s3438_s25, %s3241_s22  ;;  %p3249_p3 = scmp.lt.s32.totalorder %s3438_s25, %s3438_s25 }
  0x35   : > { %p3250_p5 = scmp.lt.s32.totalorder %s3248_s29, %s3241_s22 }
  0x36   : > { %p3244_p13 = pnand %p3242_p11, %p3202_p12 }
  0x37   : > { %p3251_p7 = por %p3250_p5, %p3249_p3 }
  0x38   : > { %p3245_p0 = pneg %p3244_p13 }
  0x3a   : > { %p3252_p9 = pnand %p3251_p7, %p3245_p0 }
  0x3c   : > { %3255 = shalt.err (!%p3252_p9)
}
  0x3d   : > { %3075 = dma.hbm_to_vmem [thread:$0]  (!%p3434_p10), %s3887_s2, 16, %s3438_s25, [#allocation6]  }
  0x3e   : > { %s3492_s5 = sadd.s32 1, %s3356_s15   ;;  %s27_s23 = sadd.s32 1, %s3352_s14 }
  0x3f   : > { %s24_s6 = ssub.s32 %s3356_s15, %s3492_s5  ;;  %p34_p12 = scmp.ne.s32.totalorder %s3352_s14, %s3348_s13 }
  0x40   : > { %p25_p1 = scmp.eq.s32.totalorder %s24_s6, 0  ;;  %p35_p2 = scmp.eq.s32.totalorder %s3356_s15, 0 }
  0x41   : > { %p3896_p4 = scmp.eq.s32.totalorder %s3407_s16, 7  ;;  %p3086_p8 = scmp.lt.s32.totalorder %s3356_s15, 8 }
  0x42   : > { %s3508_s10 = scalar_select %p25_p1, %s3352_s14, %s27_s23  }
  0x43   : > { %p3502_p6 = por %p3896_p4, %p34_p12  ;;  %p36_p11 = por %p35_p2, %p34_p12 }
  0x44   : > { %s156_s11 = sand.u32 1, %s3352_s14   ;;  %s2312_s25 = sshll.u32 %s3356_s15, 13 }
  0x45   : > { %s2098_s17 = sshll.u32 %s156_s11, 9  ;;  %s3515_s26 = scalar_lea.hbm %s3885_s0, %s2312_s25 }
  0x46   : > { %s160_s27 = scalar_lea.vmem [#allocation2], %s2098_s17  ;;  %p3519_p10 = pnand %p3086_p8, %p36_p11 }
  0x47   : > { %s167_s28 = sshll.u32 %s160_s27, 4  ;;  %s3523_s29 = scalar_lea.sflag [#allocation3], %s156_s11  ;;  %s3517_s28 = int_to_ptr.vmem [resolvable:$true] %s167_s28 }
  0x48   : > { %s3256_s30 = scalar_lea.hbm %s3515_s26, 8192  ;;  %p3258_p0 = pneg %p3519_p10 }
  0x49   : > { %p3257_p13 = scmp.ne.s32.totalorder %s3515_s26, %s3256_s30  ;;  %s3261_s6 = scalar_lea.hbm %s3885_s0, 65536 }
  0x4a   : > { %p3262_p7 = scmp.lt.u32.totalorder %s3515_s26, %s3885_s0  ;;  %p3263_p9 = scmp.lt.u32.totalorder %s3261_s6, %s3256_s30 }
  0x4b   : > { %p3259_p3 = pnand %p3258_p0, %p3257_p13  ;;  %p3265_p1 = scmp.lt.u32.totalorder %s3256_s30, %s3515_s26 }
  0x4c   : > { %p3264_p12 = por %p3263_p9, %p3262_p7 }
  0x4d   : > { %p3260_p5 = pneg %p3259_p3 }
  0x4e   : > { %p3266_p2 = por %p3265_p1, %p3264_p12 }
  0x50   : > { %p3267_p4 = pnand %p3266_p2, %p3260_p5 }
  0x52   : > { %3270 = shalt.err (!%p3267_p4)
}
  0x53   : > { %s3271_s11 = scalar_lea.vmem %s3517_s28, 8192  ;;  %s3362_s21 = smov [#allocation2]  }
  0x54   : > { %p3272_p8 = scmp.ne.s32.totalorder %s3517_s28, %s3271_s11  ;;  %s3276_s24 = sshll.u32 %s3362_s21, 4  ;;  %s3277_s24 = int_to_ptr.vmem [resolvable:$false] %s3276_s24 }
  0x55   : > { %s3278_s27 = scalar_lea.vmem %s3277_s24, 16384  ;;  %p3279_p3 = scmp.lt.s32.totalorder %s3517_s28, %s3277_s24 }
  0x56   : > { %p3274_p11 = pnand %p3272_p8, %p3258_p0  ;;  %p3280_p7 = scmp.lt.s32.totalorder %s3278_s27, %s3271_s11 }
  0x58   : > { %p3275_p13 = pneg %p3274_p11  ;;  %p3281_p9 = por %p3280_p7, %p3279_p3 }
  0x5a   : > { %p3282_p12 = pnand %p3281_p9, %p3275_p13 }
  0x5c   : > { %3285 = shalt.err (!%p3282_p12)
}
  0x5d   : > { %3079 = dma.hbm_to_vmem [thread:$0]  (!%p3519_p10), %s3515_s26, 8192, %s3517_s28, %s3523_s29, %s3360_s7, %s3360_s7, %s3361_s8  }
  0x5e   : > { %p3899_p0 = scmp.ne.s32.totalorder %s3894_s20, 0 }
  0x5f   : > { %s3557_s30 = sand.u32 (!%p3899_p0), 1, %s3348_s13   ;;  %p3900_p5 = scmp.ne.s32.totalorder (!%p3899_p0), %s3892_s18, 0 }
  0x60   : > { %179 = sbr.rel (%p3899_p0) target bundleno = 494 (0x1ee), region = 32  ;;  %s2102_s4 = sshll.u32 (!%p3899_p0), %s3557_s30, 9 }
  0x61   : > { %s182_s23 = scalar_lea.sflag (!%p3899_p0), [#allocation3], %s3557_s30  ;;  %s3563_s22 = scalar_lea.vmem (!%p3899_p0), [#allocation2], %s2102_s4 }
  0x67   : > { %3331 = dma.done.wait (%p3900_p5), %s182_s23, 8192  }
  0x68   : > { %3333 = vsyncadd (%p3900_p5), %s182_s23, 4294959104  ;;  %p3901_p10 = scmp.eq.s32.totalorder %s3407_s16, 0 }
  0x6a   : > { %3335 = dma.done.wait (%p3901_p10), [#allocation6], 1040   ;;  %p3902_p1 = pmov %p3901_p10 }
  0x6b   : > { %v3128_v0 = vld [vmem:[#allocation5] sm:$0xff]   ;;  %v3129_v1 = vld [vmem:[#allocation5 + $0x8] sm:$0xff]   ;;  %v3130_v2 = vld [vmem:[#allocation5 + $0x10] sm:$0xff]   ;;  %s3649_s18 = scalar_lea.vmem [#allocation8], %s2102_s4  ;;  %s2441_s20 = sshll.u32 %s3407_s16, 13 }
  0x6c   : > { %3337 = vsyncadd (%p3902_p1), [#allocation6], 4294966256  ;;  %2897 = vmatprep.subr.bf16.mxu0 %v3128_v0  ;;  %3041 = vmatprep.subr.bf16.mxu1 %v3128_v0  ;;  %v3131_v3 = vld [vmem:[#allocation5 + $0x18] sm:$0xff]   ;;  %v3136_v4 = vld [vmem:[%s3563_s22] sm:$0xff]   ;;  %s2001_s7 = sshll.u32 %s3649_s18, 4  ;;  %s3836_s26 = scalar_lea.hbm %s3888_s3, %s2441_s20  ;;  %s3838_s7 = int_to_ptr.vmem [resolvable:$true] %s2001_s7 }
  0x6d   : > { %2898 = vmatpush3.bf16.msra.mxu0 %v3128_v0  ;;  %3049 = vmatpush3.bf16.msra.mxu1 %v3128_v0  ;;  %v3137_v5 = vld [vmem:[%s3563_s22 + $0x100] sm:$0xff]   ;;  %v3133_v7 = vld [vmem:[#allocation5 + $0x28] sm:$0xff]   ;;  %v3134_v8 = vld [vmem:[#allocation5 + $0x30] sm:$0xff]   ;;  %s1988_s28 = scalar_lea.sflag [#allocation4], %s3557_s30  ;;  %s3286_s29 = scalar_lea.vmem %s3838_s7, 8192 }
  0x6e   : > { %2899 = vmatprep.subr.bf16.mxu0 %v3129_v1  ;;  %3042 = vmatprep.subr.bf16.mxu1 %v3129_v1  ;;  %v3132_v6 = vld [vmem:[#allocation5 + $0x20] sm:$0xff]   ;;  %v3135_v9 = vld [vmem:[#allocation5 + $0x38] sm:$0xff]   ;;  %v3138_v10 = vld [vmem:[%s3563_s22 + $0x8] sm:$0xff]   ;;  %p3287_p2 = scmp.ne.s32.totalorder %s3838_s7, %s3286_s29  ;;  %s3363_s6 = smov [#allocation8]  }
  0x6f   : > { %2913 = vmatprep.mubr.bf16.mxu0 %v3136_v4  ;;  %2977 = vmatprep.mubr.bf16.mxu1 %v3137_v5  ;;  %v3139_v11 = vld [vmem:[%s3563_s22 + $0x108] sm:$0xff]   ;;  %v3140_v12 = vld [vmem:[%s3563_s22 + $0x10] sm:$0xff]   ;;  %v3142_v14 = vld [vmem:[%s3563_s22 + $0x18] sm:$0xff]   ;;  %s3290_s17 = sshll.u32 %s3363_s6, 4  ;;  %s3291_s17 = int_to_ptr.vmem [resolvable:$false] %s3290_s17 }
  0x70   : > { %v3141_v13 = vld [vmem:[%s3563_s22 + $0x110] sm:$0xff]   ;;  %v3143_v15 = vld [vmem:[%s3563_s22 + $0x118] sm:$0xff]   ;;  %v3144_v16 = vld [vmem:[%s3563_s22 + $0x20] sm:$0xff]   ;;  %p3288_p4 = pnand %p3287_p2, %p3502_p6  ;;  %s3292_s25 = scalar_lea.vmem %s3291_s17, 16384 }
  0x71   : > { %2900 = vmatpush3.bf16.msra.mxu0 %v3129_v1  ;;  %3050 = vmatpush3.bf16.msra.mxu1 %v3129_v1  ;;  %v3145_v17 = vld [vmem:[%s3563_s22 + $0x120] sm:$0xff]   ;;  %v3146_v18 = vld [vmem:[%s3563_s22 + $0x28] sm:$0xff]   ;;  %v3148_v20 = vld [vmem:[%s3563_s22 + $0x30] sm:$0xff]   ;;  %p3293_p11 = scmp.lt.s32.totalorder %s3838_s7, %s3291_s17  ;;  %p3294_p13 = scmp.lt.s32.totalorder %s3292_s25, %s3286_s29 }
  0x72   : > { %2901 = vmatprep.subr.bf16.mxu0 %v3130_v2  ;;  %3043 = vmatprep.subr.bf16.mxu1 %v3130_v2  ;;  %v3147_v19 = vld [vmem:[%s3563_s22 + $0x128] sm:$0xff]   ;;  %v3149_v21 = vld [vmem:[%s3563_s22 + $0x130] sm:$0xff]   ;;  %v3150_v22 = vld [vmem:[%s3563_s22 + $0x38] sm:$0xff]   ;;  %p3289_p8 = pneg %p3288_p4 }
  0x73   : > { %v3151_v23 = vld [vmem:[%s3563_s22 + $0x138] sm:$0xff]   ;;  %v3152_v24 = vld [vmem:[%s3563_s22 + $0x40] sm:$0xff]   ;;  %v3154_v26 = vld [vmem:[%s3563_s22 + $0x48] sm:$0xff]   ;;  %p3295_p3 = por %p3294_p13, %p3293_p11 }
  0x74   : > { %v3153_v25 = vld [vmem:[%s3563_s22 + $0x140] sm:$0xff]   ;;  %v3155_v27 = vld [vmem:[%s3563_s22 + $0x148] sm:$0xff]   ;;  %v3156_v28 = vld [vmem:[%s3563_s22 + $0x50] sm:$0xff]  }
  0x75   : > { %2902 = vmatpush3.bf16.msra.mxu0 %v3130_v2  ;;  %3051 = vmatpush3.bf16.msra.mxu1 %v3130_v2  ;;  %v3157_v29 = vld [vmem:[%s3563_s22 + $0x150] sm:$0xff]   ;;  %v3158_v30 = vld [vmem:[%s3563_s22 + $0x58] sm:$0xff]   ;;  %v3160_v32 = vld [vmem:[%s3563_s22 + $0x60] sm:$0xff]   ;;  %p3296_p7 = pnand %p3295_p3, %p3289_p8 }
  0x76   : > { %2903 = vmatprep.subr.bf16.mxu0 %v3131_v3  ;;  %3044 = vmatprep.subr.bf16.mxu1 %v3131_v3  ;;  %v3159_v31 = vld [vmem:[%s3563_s22 + $0x158] sm:$0xff]   ;;  %v3161_v33 = vld [vmem:[%s3563_s22 + $0x160] sm:$0xff]   ;;  %v3162_v34 = vld [vmem:[%s3563_s22 + $0x68] sm:$0xff]  }
  0x77   : > { %v3163_v35 = vld [vmem:[%s3563_s22 + $0x168] sm:$0xff]   ;;  %v3164_v36 = vld [vmem:[%s3563_s22 + $0x70] sm:$0xff]   ;;  %v3166_v38 = vld [vmem:[%s3563_s22 + $0x78] sm:$0xff]  }
  0x78   : > { %v3165_v37 = vld [vmem:[%s3563_s22 + $0x170] sm:$0xff]   ;;  %v3167_v39 = vld [vmem:[%s3563_s22 + $0x178] sm:$0xff]   ;;  %v3168_v40 = vld [vmem:[%s3563_s22 + $0x80] sm:$0xff]  }
  0x79   : > { %2904 = vmatpush3.bf16.msra.mxu0 %v3131_v3  ;;  %3052 = vmatpush3.bf16.msra.mxu1 %v3131_v3  ;;  %v3169_v41 = vld [vmem:[%s3563_s22 + $0x180] sm:$0xff]   ;;  %v3170_v42 = vld [vmem:[%s3563_s22 + $0x88] sm:$0xff]   ;;  %v3172_v44 = vld [vmem:[%s3563_s22 + $0x90] sm:$0xff]  }
  0x7a   : > { %2905 = vmatprep.subr.bf16.mxu0 %v3132_v6  ;;  %3045 = vmatprep.subr.bf16.mxu1 %v3132_v6  ;;  %v3171_v43 = vld [vmem:[%s3563_s22 + $0x188] sm:$0xff]   ;;  %v3173_v45 = vld [vmem:[%s3563_s22 + $0x190] sm:$0xff]   ;;  %v3174_v46 = vld [vmem:[%s3563_s22 + $0x98] sm:$0xff]  }
  0x7b   : > { %v3175_v47 = vld [vmem:[%s3563_s22 + $0x198] sm:$0xff]   ;;  %v3176_v48 = vld [vmem:[%s3563_s22 + $0xa0] sm:$0xff]   ;;  %v3178_v50 = vld [vmem:[%s3563_s22 + $0xa8] sm:$0xff]  }
  0x7c   : > { %v3177_v49 = vld [vmem:[%s3563_s22 + $0x1a0] sm:$0xff]   ;;  %v3179_v51 = vld [vmem:[%s3563_s22 + $0x1a8] sm:$0xff]   ;;  %v3180_v52 = vld [vmem:[%s3563_s22 + $0xb0] sm:$0xff]  }
  0x7d   : > { %2906 = vmatpush3.bf16.msra.mxu0 %v3132_v6  ;;  %3053 = vmatpush3.bf16.msra.mxu1 %v3132_v6  ;;  %v3181_v53 = vld [vmem:[%s3563_s22 + $0x1b0] sm:$0xff]   ;;  %v3182_v54 = vld [vmem:[%s3563_s22 + $0xb8] sm:$0xff]   ;;  %v3184_v56 = vld [vmem:[%s3563_s22 + $0xc0] sm:$0xff]  }
  0x7e   : > { %2907 = vmatprep.subr.bf16.mxu0 %v3133_v7  ;;  %3046 = vmatprep.subr.bf16.mxu1 %v3133_v7  ;;  %v3183_v55 = vld [vmem:[%s3563_s22 + $0x1b8] sm:$0xff]   ;;  %v3185_v57 = vld [vmem:[%s3563_s22 + $0x1c0] sm:$0xff]   ;;  %v3186_v58 = vld [vmem:[%s3563_s22 + $0xc8] sm:$0xff]  }
  0x7f   : > { %v3187_v59 = vld [vmem:[%s3563_s22 + $0x1c8] sm:$0xff]   ;;  %v3188_v60 = vld [vmem:[%s3563_s22 + $0xd0] sm:$0xff]   ;;  %v3190_v62 = vld [vmem:[%s3563_s22 + $0xd8] sm:$0xff]  }
  0x80   : > { %v3189_v61 = vld [vmem:[%s3563_s22 + $0x1d0] sm:$0xff]   ;;  %v3191_v63 = vld [vmem:[%s3563_s22 + $0x1d8] sm:$0xff]   ;;  %v3192_v0 = vld [vmem:[%s3563_s22 + $0xe0] sm:$0xff]  }
  0x81   : > { %2908 = vmatpush3.bf16.msra.mxu0 %v3133_v7  ;;  %3054 = vmatpush3.bf16.msra.mxu1 %v3133_v7  ;;  %v3193_v1 = vld [vmem:[%s3563_s22 + $0x1e0] sm:$0xff]   ;;  %v3194_v2 = vld [vmem:[%s3563_s22 + $0xe8] sm:$0xff]   ;;  %v3196_v4 = vld [vmem:[%s3563_s22 + $0xf0] sm:$0xff]  }
  0x82   : > { %2909 = vmatprep.subr.bf16.mxu0 %v3134_v8  ;;  %3047 = vmatprep.subr.bf16.mxu1 %v3134_v8  ;;  %v3195_v3 = vld [vmem:[%s3563_s22 + $0x1e8] sm:$0xff]   ;;  %v3197_v5 = vld [vmem:[%s3563_s22 + $0x1f0] sm:$0xff]   ;;  %v3198_v6 = vld [vmem:[%s3563_s22 + $0xf8] sm:$0xff]  }
  0x83   : > { %v3199_v7 = vld [vmem:[%s3563_s22 + $0x1f8] sm:$0xff]  }
  0x85   : > { %2910 = vmatpush3.bf16.msra.mxu0 %v3134_v8  ;;  %3055 = vmatpush3.bf16.msra.mxu1 %v3134_v8 }
  0x86   : > { %2911 = vmatprep.subr.bf16.mxu0 %v3135_v9  ;;  %3048 = vmatprep.subr.bf16.mxu1 %v3135_v9 }
  0x89   : > { %2912 = vmatpush3.bf16.msra.mxu0 %v3135_v9  ;;  %3056 = vmatpush3.bf16.msra.mxu1 %v3135_v9  ;;  %v3637_v9 = vld [vmem:[#allocation7] ss:$0 sm:$0xff] }
  0x8c   : > { %2914 = vmatmul.mubr.bf16.vlgmr.msra.gmra.mrb[0].mxu0 %v3138_v10  ;;  %2978 = vmatmul.mubr.bf16.vlgmr.msra.gmra.mrb[0].mxu1 %v3139_v11 }
  0x8d   : > { %2917 = vmatprep.mubr.bf16.mxu0 %v3140_v12  ;;  %2981 = vmatprep.mubr.bf16.mxu1 %v3141_v13 }
  0x94   : > { %2918 = vmatmul.mubr.bf16.gmra.mrb[4].mxu0 %v3142_v14  ;;  %2982 = vmatmul.mubr.bf16.gmra.mrb[4].mxu1 %v3143_v15 }
  0x95   : > { %2921 = vmatprep.mubr.bf16.mxu0 %v3144_v16  ;;  %2985 = vmatprep.mubr.bf16.mxu1 %v3145_v17 }
  0x9c   : > { %2922 = vmatmul.mubr.bf16.gmra.mrb[8].mxu0 %v3146_v18  ;;  %2986 = vmatmul.mubr.bf16.gmra.mrb[8].mxu1 %v3147_v19 }
  0x9d   : > { %2925 = vmatprep.mubr.bf16.mxu0 %v3148_v20  ;;  %2989 = vmatprep.mubr.bf16.mxu1 %v3149_v21 }
  0xa4   : > { %2926 = vmatmul.mubr.bf16.gmra.mrb[12].mxu0 %v3150_v22  ;;  %2990 = vmatmul.mubr.bf16.gmra.mrb[12].mxu1 %v3151_v23 }
  0xa5   : > { %2929 = vmatprep.mubr.bf16.mxu0 %v3152_v24  ;;  %2993 = vmatprep.mubr.bf16.mxu1 %v3153_v25 }
  0xac   : > { %2930 = vmatmul.mubr.bf16.gmra.mrb[16].mxu0 %v3154_v26  ;;  %2994 = vmatmul.mubr.bf16.gmra.mrb[16].mxu1 %v3155_v27 }
  0xad   : > { %2933 = vmatprep.mubr.bf16.mxu0 %v3156_v28  ;;  %2997 = vmatprep.mubr.bf16.mxu1 %v3157_v29 }
  0xb4   : > { %2934 = vmatmul.mubr.bf16.gmra.mrb[20].mxu0 %v3158_v30  ;;  %2998 = vmatmul.mubr.bf16.gmra.mrb[20].mxu1 %v3159_v31 }
  0xb5   : > { %2937 = vmatprep.mubr.bf16.mxu0 %v3160_v32  ;;  %3001 = vmatprep.mubr.bf16.mxu1 %v3161_v33 }
  0xbc   : > { %2938 = vmatmul.mubr.bf16.gmra.mrb[24].mxu0 %v3162_v34  ;;  %3002 = vmatmul.mubr.bf16.gmra.mrb[24].mxu1 %v3163_v35 }
  0xbd   : > { %2941 = vmatprep.mubr.bf16.mxu0 %v3164_v36  ;;  %3005 = vmatprep.mubr.bf16.mxu1 %v3165_v37 }
  0xc4   : > { %2942 = vmatmul.mubr.bf16.gmra.mrb[28].mxu0 %v3166_v38  ;;  %3006 = vmatmul.mubr.bf16.gmra.mrb[28].mxu1 %v3167_v39 }
  0xc5   : > { %2945 = vmatprep.mubr.bf16.mxu0 %v3168_v40  ;;  %3009 = vmatprep.mubr.bf16.mxu1 %v3169_v41 }
  0xcc   : > { %2946 = vmatmul.mubr.bf16.gmra.mrb[32].mxu0 %v3170_v42  ;;  %3010 = vmatmul.mubr.bf16.gmra.mrb[32].mxu1 %v3171_v43 }
  0xcd   : > { %2949 = vmatprep.mubr.bf16.mxu0 %v3172_v44  ;;  %3013 = vmatprep.mubr.bf16.mxu1 %v3173_v45 }
  0xd4   : > { %2950 = vmatmul.mubr.bf16.gmra.mrb[36].mxu0 %v3174_v46  ;;  %3014 = vmatmul.mubr.bf16.gmra.mrb[36].mxu1 %v3175_v47 }
  0xd5   : > { %2953 = vmatprep.mubr.bf16.mxu0 %v3176_v48  ;;  %3017 = vmatprep.mubr.bf16.mxu1 %v3177_v49 }
  0xdc   : > { %2954 = vmatmul.mubr.bf16.gmra.mrb[40].mxu0 %v3178_v50  ;;  %3018 = vmatmul.mubr.bf16.gmra.mrb[40].mxu1 %v3179_v51 }
  0xdd   : > { %2957 = vmatprep.mubr.bf16.mxu0 %v3180_v52  ;;  %3021 = vmatprep.mubr.bf16.mxu1 %v3181_v53 }
  0xe4   : > { %2958 = vmatmul.mubr.bf16.gmra.mrb[44].mxu0 %v3182_v54  ;;  %3022 = vmatmul.mubr.bf16.gmra.mrb[44].mxu1 %v3183_v55 }
  0xe5   : > { %2961 = vmatprep.mubr.bf16.mxu0 %v3184_v56  ;;  %3025 = vmatprep.mubr.bf16.mxu1 %v3185_v57 }
  0xec   : > { %2962 = vmatmul.mubr.bf16.gmra.mrb[48].mxu0 %v3186_v58  ;;  %3026 = vmatmul.mubr.bf16.gmra.mrb[48].mxu1 %v3187_v59 }
  0xed   : > { %2965 = vmatprep.mubr.bf16.mxu0 %v3188_v60  ;;  %3029 = vmatprep.mubr.bf16.mxu1 %v3189_v61 }
  0xf4   : > { %2966 = vmatmul.mubr.bf16.gmra.mrb[52].mxu0 %v3190_v62  ;;  %3030 = vmatmul.mubr.bf16.gmra.mrb[52].mxu1 %v3191_v63 }
  0xf5   : > { %2969 = vmatprep.mubr.bf16.mxu0 %v3192_v0  ;;  %3033 = vmatprep.mubr.bf16.mxu1 %v3193_v1 }
  0xfc   : > { %2970 = vmatmul.mubr.bf16.gmra.mrb[56].mxu0 %v3194_v2  ;;  %3034 = vmatmul.mubr.bf16.gmra.mrb[56].mxu1 %v3195_v3 }
  0xfd   : > { %2973 = vmatprep.mubr.bf16.mxu0 %v3196_v4  ;;  %3037 = vmatprep.mubr.bf16.mxu1 %v3197_v5 }
 0x104   : > { %2974 = vmatmul.mubr.bf16.gmra.mrb[60].mxu0 %v3198_v6  ;;  %3038 = vmatmul.mubr.bf16.gmra.mrb[60].mxu1 %v3199_v7 }
 0x15f   : > { %v2915_v8 = vpop.f32.mrb[0].mxu0  ;;  %v2979_v10 = vpop.f32.mrb[0].mxu1 }
 0x160   : > { %v836_v11 = vpop.f32.mrb[1].mxu0  ;;  %v1092_v12 = vpop.f32.mrb[1].mxu1  ;;  %v845_v15 = vadd.f32 %v2915_v8, %v3637_v9  ;;  %v1101_v16 = vadd.f32 %v2979_v10, %v3637_v9 }
 0x161   : > { %v2916_v13 = vpop.f32.mrb[2].mxu0  ;;  %v2980_v14 = vpop.f32.mrb[2].mxu1  ;;  %v837_v21 = vadd.f32 %v3637_v9, %v836_v11  ;;  %v1093_v22 = vadd.f32 %v3637_v9, %v1092_v12 }
 0x162   : > { %v848_v17 = vadd.f32 %v2916_v13, %v3637_v9  ;;  %v1104_v18 = vadd.f32 %v2980_v14, %v3637_v9  ;;  %v839_v19 = vpop.f32.mrb[3].mxu0  ;;  %v1095_v20 = vpop.f32.mrb[3].mxu1 }
 0x163   : > { %v840_v23 = vadd.f32 %v3637_v9, %v839_v19  ;;  %v1096_v24 = vadd.f32 %v3637_v9, %v1095_v20 }
 0x164   : > { %v2450_v25 = vpack.c.bf16 %v848_v17, %v845_v15  ;;  %v2610_v26 = vpack.c.bf16 %v1104_v18, %v1101_v16 }
 0x165   : > { %v2445_v27 = vpack.c.bf16 %v840_v23, %v837_v21  ;;  %v2605_v28 = vpack.c.bf16 %v1096_v24, %v1093_v22 }
 0x166   : > { %2762 = vst [vmem:[%s3649_s18 + $0x8] sm:$0xff] %v2450_v25   ;;  %2794 = vst [vmem:[%s3649_s18 + $0x108] sm:$0xff] %v2610_v26  }
 0x167   : > { %2446 = vst [vmem:[%s3649_s18] sm:$0xff] %v2445_v27   ;;  %2793 = vst [vmem:[%s3649_s18 + $0x100] sm:$0xff] %v2605_v28   ;;  %v2919_v29 = vpop.f32.mrb[4].mxu0  ;;  %v2983_v30 = vpop.f32.mrb[4].mxu1 }
 0x168   : > { %v852_v31 = vpop.f32.mrb[5].mxu0  ;;  %v1108_v32 = vpop.f32.mrb[5].mxu1  ;;  %v861_v35 = vadd.f32 %v2919_v29, %v3637_v9  ;;  %v1117_v36 = vadd.f32 %v2983_v30, %v3637_v9 }
 0x169   : > { %v2920_v33 = vpop.f32.mrb[6].mxu0  ;;  %v2984_v34 = vpop.f32.mrb[6].mxu1  ;;  %v853_v41 = vadd.f32 %v3637_v9, %v852_v31  ;;  %v1109_v42 = vadd.f32 %v3637_v9, %v1108_v32 }
 0x16a   : > { %v864_v37 = vadd.f32 %v2920_v33, %v3637_v9  ;;  %v1120_v38 = vadd.f32 %v2984_v34, %v3637_v9  ;;  %v855_v39 = vpop.f32.mrb[7].mxu0  ;;  %v1111_v40 = vpop.f32.mrb[7].mxu1 }
 0x16b   : > { %v856_v43 = vadd.f32 %v3637_v9, %v855_v39  ;;  %v1112_v44 = vadd.f32 %v3637_v9, %v1111_v40 }
 0x16c   : > { %v2460_v45 = vpack.c.bf16 %v864_v37, %v861_v35  ;;  %v2620_v46 = vpack.c.bf16 %v1120_v38, %v1117_v36 }
 0x16d   : > { %v2455_v47 = vpack.c.bf16 %v856_v43, %v853_v41  ;;  %v2615_v48 = vpack.c.bf16 %v1112_v44, %v1109_v42 }
 0x16e   : > { %2764 = vst [vmem:[%s3649_s18 + $0x18] sm:$0xff] %v2460_v45   ;;  %2796 = vst [vmem:[%s3649_s18 + $0x118] sm:$0xff] %v2620_v46  }
 0x16f   : > { %2763 = vst [vmem:[%s3649_s18 + $0x10] sm:$0xff] %v2455_v47   ;;  %2795 = vst [vmem:[%s3649_s18 + $0x110] sm:$0xff] %v2615_v48   ;;  %v2923_v49 = vpop.f32.mrb[8].mxu0  ;;  %v2987_v50 = vpop.f32.mrb[8].mxu1 }
 0x170   : > { %v868_v51 = vpop.f32.mrb[9].mxu0  ;;  %v1124_v52 = vpop.f32.mrb[9].mxu1  ;;  %v877_v55 = vadd.f32 %v2923_v49, %v3637_v9  ;;  %v1133_v56 = vadd.f32 %v2987_v50, %v3637_v9 }
 0x171   : > { %v2924_v53 = vpop.f32.mrb[10].mxu0  ;;  %v2988_v54 = vpop.f32.mrb[10].mxu1  ;;  %v869_v61 = vadd.f32 %v3637_v9, %v868_v51  ;;  %v1125_v62 = vadd.f32 %v3637_v9, %v1124_v52 }
 0x172   : > { %v880_v57 = vadd.f32 %v2924_v53, %v3637_v9  ;;  %v1136_v58 = vadd.f32 %v2988_v54, %v3637_v9  ;;  %v871_v59 = vpop.f32.mrb[11].mxu0  ;;  %v1127_v60 = vpop.f32.mrb[11].mxu1 }
 0x173   : > { %v872_v63 = vadd.f32 %v3637_v9, %v871_v59  ;;  %v1128_v0 = vadd.f32 %v3637_v9, %v1127_v60 }
 0x174   : > { %v2470_v1 = vpack.c.bf16 %v880_v57, %v877_v55  ;;  %v2630_v2 = vpack.c.bf16 %v1136_v58, %v1133_v56 }
 0x175   : > { %v2465_v3 = vpack.c.bf16 %v872_v63, %v869_v61  ;;  %v2625_v4 = vpack.c.bf16 %v1128_v0, %v1125_v62 }
 0x176   : > { %2766 = vst [vmem:[%s3649_s18 + $0x28] sm:$0xff] %v2470_v1   ;;  %2798 = vst [vmem:[%s3649_s18 + $0x128] sm:$0xff] %v2630_v2  }
 0x177   : > { %2765 = vst [vmem:[%s3649_s18 + $0x20] sm:$0xff] %v2465_v3   ;;  %2797 = vst [vmem:[%s3649_s18 + $0x120] sm:$0xff] %v2625_v4   ;;  %v2927_v5 = vpop.f32.mrb[12].mxu0  ;;  %v2991_v6 = vpop.f32.mrb[12].mxu1 }
 0x178   : > { %v884_v7 = vpop.f32.mrb[13].mxu0  ;;  %v1140_v8 = vpop.f32.mrb[13].mxu1  ;;  %v893_v12 = vadd.f32 %v2927_v5, %v3637_v9  ;;  %v1149_v13 = vadd.f32 %v2991_v6, %v3637_v9 }
 0x179   : > { %v2928_v10 = vpop.f32.mrb[14].mxu0  ;;  %v2992_v11 = vpop.f32.mrb[14].mxu1  ;;  %v885_v18 = vadd.f32 %v3637_v9, %v884_v7  ;;  %v1141_v19 = vadd.f32 %v3637_v9, %v1140_v8 }
 0x17a   : > { %v896_v14 = vadd.f32 %v2928_v10, %v3637_v9  ;;  %v1152_v15 = vadd.f32 %v2992_v11, %v3637_v9  ;;  %v887_v16 = vpop.f32.mrb[15].mxu0  ;;  %v1143_v17 = vpop.f32.mrb[15].mxu1 }
 0x17b   : > { %v888_v20 = vadd.f32 %v3637_v9, %v887_v16  ;;  %v1144_v21 = vadd.f32 %v3637_v9, %v1143_v17 }
 0x17c   : > { %v2480_v22 = vpack.c.bf16 %v896_v14, %v893_v12  ;;  %v2640_v23 = vpack.c.bf16 %v1152_v15, %v1149_v13 }
 0x17d   : > { %v2475_v24 = vpack.c.bf16 %v888_v20, %v885_v18  ;;  %v2635_v25 = vpack.c.bf16 %v1144_v21, %v1141_v19 }
 0x17e   : > { %2768 = vst [vmem:[%s3649_s18 + $0x38] sm:$0xff] %v2480_v22   ;;  %2800 = vst [vmem:[%s3649_s18 + $0x138] sm:$0xff] %v2640_v23  }
 0x17f   : > { %2767 = vst [vmem:[%s3649_s18 + $0x30] sm:$0xff] %v2475_v24   ;;  %2799 = vst [vmem:[%s3649_s18 + $0x130] sm:$0xff] %v2635_v25   ;;  %v2931_v26 = vpop.f32.mrb[16].mxu0  ;;  %v2995_v27 = vpop.f32.mrb[16].mxu1 }
 0x180   : > { %v900_v28 = vpop.f32.mrb[17].mxu0  ;;  %v1156_v29 = vpop.f32.mrb[17].mxu1  ;;  %v909_v32 = vadd.f32 %v2931_v26, %v3637_v9  ;;  %v1165_v33 = vadd.f32 %v2995_v27, %v3637_v9 }
 0x181   : > { %v2932_v30 = vpop.f32.mrb[18].mxu0  ;;  %v2996_v31 = vpop.f32.mrb[18].mxu1  ;;  %v901_v38 = vadd.f32 %v3637_v9, %v900_v28  ;;  %v1157_v39 = vadd.f32 %v3637_v9, %v1156_v29 }
 0x182   : > { %v912_v34 = vadd.f32 %v2932_v30, %v3637_v9  ;;  %v1168_v35 = vadd.f32 %v2996_v31, %v3637_v9  ;;  %v903_v36 = vpop.f32.mrb[19].mxu0  ;;  %v1159_v37 = vpop.f32.mrb[19].mxu1 }
 0x183   : > { %v904_v40 = vadd.f32 %v3637_v9, %v903_v36  ;;  %v1160_v41 = vadd.f32 %v3637_v9, %v1159_v37 }
 0x184   : > { %v2490_v42 = vpack.c.bf16 %v912_v34, %v909_v32  ;;  %v2650_v43 = vpack.c.bf16 %v1168_v35, %v1165_v33 }
 0x185   : > { %v2485_v44 = vpack.c.bf16 %v904_v40, %v901_v38  ;;  %v2645_v45 = vpack.c.bf16 %v1160_v41, %v1157_v39 }
 0x186   : > { %2770 = vst [vmem:[%s3649_s18 + $0x48] sm:$0xff] %v2490_v42   ;;  %2802 = vst [vmem:[%s3649_s18 + $0x148] sm:$0xff] %v2650_v43  }
 0x187   : > { %2769 = vst [vmem:[%s3649_s18 + $0x40] sm:$0xff] %v2485_v44   ;;  %2801 = vst [vmem:[%s3649_s18 + $0x140] sm:$0xff] %v2645_v45   ;;  %v2935_v46 = vpop.f32.mrb[20].mxu0  ;;  %v2999_v47 = vpop.f32.mrb[20].mxu1 }
 0x188   : > { %v916_v48 = vpop.f32.mrb[21].mxu0  ;;  %v1172_v49 = vpop.f32.mrb[21].mxu1  ;;  %v925_v52 = vadd.f32 %v2935_v46, %v3637_v9  ;;  %v1181_v53 = vadd.f32 %v2999_v47, %v3637_v9 }
 0x189   : > { %v2936_v50 = vpop.f32.mrb[22].mxu0  ;;  %v3000_v51 = vpop.f32.mrb[22].mxu1  ;;  %v917_v58 = vadd.f32 %v3637_v9, %v916_v48  ;;  %v1173_v59 = vadd.f32 %v3637_v9, %v1172_v49 }
 0x18a   : > { %v928_v54 = vadd.f32 %v2936_v50, %v3637_v9  ;;  %v1184_v55 = vadd.f32 %v3000_v51, %v3637_v9  ;;  %v919_v56 = vpop.f32.mrb[23].mxu0  ;;  %v1175_v57 = vpop.f32.mrb[23].mxu1 }
 0x18b   : > { %v920_v60 = vadd.f32 %v3637_v9, %v919_v56  ;;  %v1176_v61 = vadd.f32 %v3637_v9, %v1175_v57 }
 0x18c   : > { %v2500_v62 = vpack.c.bf16 %v928_v54, %v925_v52  ;;  %v2660_v63 = vpack.c.bf16 %v1184_v55, %v1181_v53 }
 0x18d   : > { %v2495_v0 = vpack.c.bf16 %v920_v60, %v917_v58  ;;  %v2655_v1 = vpack.c.bf16 %v1176_v61, %v1173_v59 }
 0x18e   : > { %2772 = vst [vmem:[%s3649_s18 + $0x58] sm:$0xff] %v2500_v62   ;;  %2804 = vst [vmem:[%s3649_s18 + $0x158] sm:$0xff] %v2660_v63  }
 0x18f   : > { %2771 = vst [vmem:[%s3649_s18 + $0x50] sm:$0xff] %v2495_v0   ;;  %2803 = vst [vmem:[%s3649_s18 + $0x150] sm:$0xff] %v2655_v1   ;;  %v2939_v2 = vpop.f32.mrb[24].mxu0  ;;  %v3003_v3 = vpop.f32.mrb[24].mxu1 }
 0x190   : > { %v932_v4 = vpop.f32.mrb[25].mxu0  ;;  %v1188_v5 = vpop.f32.mrb[25].mxu1  ;;  %v941_v8 = vadd.f32 %v2939_v2, %v3637_v9  ;;  %v1197_v10 = vadd.f32 %v3003_v3, %v3637_v9 }
 0x191   : > { %v2940_v6 = vpop.f32.mrb[26].mxu0  ;;  %v3004_v7 = vpop.f32.mrb[26].mxu1  ;;  %v933_v15 = vadd.f32 %v3637_v9, %v932_v4  ;;  %v1189_v16 = vadd.f32 %v3637_v9, %v1188_v5 }
 0x192   : > { %v944_v11 = vadd.f32 %v2940_v6, %v3637_v9  ;;  %v1200_v12 = vadd.f32 %v3004_v7, %v3637_v9  ;;  %v935_v13 = vpop.f32.mrb[27].mxu0  ;;  %v1191_v14 = vpop.f32.mrb[27].mxu1 }
 0x193   : > { %v936_v17 = vadd.f32 %v3637_v9, %v935_v13  ;;  %v1192_v18 = vadd.f32 %v3637_v9, %v1191_v14 }
 0x194   : > { %v2510_v19 = vpack.c.bf16 %v944_v11, %v941_v8  ;;  %v2670_v20 = vpack.c.bf16 %v1200_v12, %v1197_v10 }
 0x195   : > { %v2505_v21 = vpack.c.bf16 %v936_v17, %v933_v15  ;;  %v2665_v22 = vpack.c.bf16 %v1192_v18, %v1189_v16 }
 0x196   : > { %2774 = vst [vmem:[%s3649_s18 + $0x68] sm:$0xff] %v2510_v19   ;;  %2806 = vst [vmem:[%s3649_s18 + $0x168] sm:$0xff] %v2670_v20  }
 0x197   : > { %2773 = vst [vmem:[%s3649_s18 + $0x60] sm:$0xff] %v2505_v21   ;;  %2805 = vst [vmem:[%s3649_s18 + $0x160] sm:$0xff] %v2665_v22   ;;  %v2943_v23 = vpop.f32.mrb[28].mxu0  ;;  %v3007_v24 = vpop.f32.mrb[28].mxu1 }
 0x198   : > { %v948_v25 = vpop.f32.mrb[29].mxu0  ;;  %v1204_v26 = vpop.f32.mrb[29].mxu1  ;;  %v957_v29 = vadd.f32 %v2943_v23, %v3637_v9  ;;  %v1213_v30 = vadd.f32 %v3007_v24, %v3637_v9 }
 0x199   : > { %v2944_v27 = vpop.f32.mrb[30].mxu0  ;;  %v3008_v28 = vpop.f32.mrb[30].mxu1  ;;  %v949_v35 = vadd.f32 %v3637_v9, %v948_v25  ;;  %v1205_v36 = vadd.f32 %v3637_v9, %v1204_v26 }
 0x19a   : > { %v960_v31 = vadd.f32 %v2944_v27, %v3637_v9  ;;  %v1216_v32 = vadd.f32 %v3008_v28, %v3637_v9  ;;  %v951_v33 = vpop.f32.mrb[31].mxu0  ;;  %v1207_v34 = vpop.f32.mrb[31].mxu1 }
 0x19b   : > { %v952_v37 = vadd.f32 %v3637_v9, %v951_v33  ;;  %v1208_v38 = vadd.f32 %v3637_v9, %v1207_v34 }
 0x19c   : > { %v2520_v39 = vpack.c.bf16 %v960_v31, %v957_v29  ;;  %v2680_v40 = vpack.c.bf16 %v1216_v32, %v1213_v30 }
 0x19d   : > { %v2515_v41 = vpack.c.bf16 %v952_v37, %v949_v35  ;;  %v2675_v42 = vpack.c.bf16 %v1208_v38, %v1205_v36 }
 0x19e   : > { %2776 = vst [vmem:[%s3649_s18 + $0x78] sm:$0xff] %v2520_v39   ;;  %2808 = vst [vmem:[%s3649_s18 + $0x178] sm:$0xff] %v2680_v40  }
 0x19f   : > { %2775 = vst [vmem:[%s3649_s18 + $0x70] sm:$0xff] %v2515_v41   ;;  %2807 = vst [vmem:[%s3649_s18 + $0x170] sm:$0xff] %v2675_v42   ;;  %v2947_v43 = vpop.f32.mrb[32].mxu0  ;;  %v3011_v44 = vpop.f32.mrb[32].mxu1 }
 0x1a0   : > { %v964_v45 = vpop.f32.mrb[33].mxu0  ;;  %v1220_v46 = vpop.f32.mrb[33].mxu1  ;;  %v973_v49 = vadd.f32 %v2947_v43, %v3637_v9  ;;  %v1229_v50 = vadd.f32 %v3011_v44, %v3637_v9 }
 0x1a1   : > { %v2948_v47 = vpop.f32.mrb[34].mxu0  ;;  %v3012_v48 = vpop.f32.mrb[34].mxu1  ;;  %v965_v55 = vadd.f32 %v3637_v9, %v964_v45  ;;  %v1221_v56 = vadd.f32 %v3637_v9, %v1220_v46 }
 0x1a2   : > { %v976_v51 = vadd.f32 %v2948_v47, %v3637_v9  ;;  %v1232_v52 = vadd.f32 %v3012_v48, %v3637_v9  ;;  %v967_v53 = vpop.f32.mrb[35].mxu0  ;;  %v1223_v54 = vpop.f32.mrb[35].mxu1 }
 0x1a3   : > { %v968_v57 = vadd.f32 %v3637_v9, %v967_v53  ;;  %v1224_v58 = vadd.f32 %v3637_v9, %v1223_v54 }
 0x1a4   : > { %v2530_v59 = vpack.c.bf16 %v976_v51, %v973_v49  ;;  %v2690_v60 = vpack.c.bf16 %v1232_v52, %v1229_v50 }
 0x1a5   : > { %v2525_v61 = vpack.c.bf16 %v968_v57, %v965_v55  ;;  %v2685_v62 = vpack.c.bf16 %v1224_v58, %v1221_v56 }
 0x1a6   : > { %2778 = vst [vmem:[%s3649_s18 + $0x88] sm:$0xff] %v2530_v59   ;;  %2810 = vst [vmem:[%s3649_s18 + $0x188] sm:$0xff] %v2690_v60  }
 0x1a7   : > { %2777 = vst [vmem:[%s3649_s18 + $0x80] sm:$0xff] %v2525_v61   ;;  %2809 = vst [vmem:[%s3649_s18 + $0x180] sm:$0xff] %v2685_v62   ;;  %v2951_v63 = vpop.f32.mrb[36].mxu0  ;;  %v3015_v0 = vpop.f32.mrb[36].mxu1 }
 0x1a8   : > { %v980_v1 = vpop.f32.mrb[37].mxu0  ;;  %v1236_v2 = vpop.f32.mrb[37].mxu1  ;;  %v989_v5 = vadd.f32 %v2951_v63, %v3637_v9  ;;  %v1245_v6 = vadd.f32 %v3015_v0, %v3637_v9 }
 0x1a9   : > { %v2952_v3 = vpop.f32.mrb[38].mxu0  ;;  %v3016_v4 = vpop.f32.mrb[38].mxu1  ;;  %v981_v12 = vadd.f32 %v3637_v9, %v980_v1  ;;  %v1237_v13 = vadd.f32 %v3637_v9, %v1236_v2 }
 0x1aa   : > { %v992_v7 = vadd.f32 %v2952_v3, %v3637_v9  ;;  %v1248_v8 = vadd.f32 %v3016_v4, %v3637_v9  ;;  %v983_v10 = vpop.f32.mrb[39].mxu0  ;;  %v1239_v11 = vpop.f32.mrb[39].mxu1 }
 0x1ab   : > { %v984_v14 = vadd.f32 %v3637_v9, %v983_v10  ;;  %v1240_v15 = vadd.f32 %v3637_v9, %v1239_v11 }
 0x1ac   : > { %v2540_v16 = vpack.c.bf16 %v992_v7, %v989_v5  ;;  %v2700_v17 = vpack.c.bf16 %v1248_v8, %v1245_v6 }
 0x1ad   : > { %v2535_v18 = vpack.c.bf16 %v984_v14, %v981_v12  ;;  %v2695_v19 = vpack.c.bf16 %v1240_v15, %v1237_v13 }
 0x1ae   : > { %2780 = vst [vmem:[%s3649_s18 + $0x98] sm:$0xff] %v2540_v16   ;;  %2812 = vst [vmem:[%s3649_s18 + $0x198] sm:$0xff] %v2700_v17  }
 0x1af   : > { %2779 = vst [vmem:[%s3649_s18 + $0x90] sm:$0xff] %v2535_v18   ;;  %2811 = vst [vmem:[%s3649_s18 + $0x190] sm:$0xff] %v2695_v19   ;;  %v2955_v20 = vpop.f32.mrb[40].mxu0  ;;  %v3019_v21 = vpop.f32.mrb[40].mxu1 }
 0x1b0   : > { %v996_v22 = vpop.f32.mrb[41].mxu0  ;;  %v1252_v23 = vpop.f32.mrb[41].mxu1  ;;  %v1005_v26 = vadd.f32 %v2955_v20, %v3637_v9  ;;  %v1261_v27 = vadd.f32 %v3019_v21, %v3637_v9 }
 0x1b1   : > { %v2956_v24 = vpop.f32.mrb[42].mxu0  ;;  %v3020_v25 = vpop.f32.mrb[42].mxu1  ;;  %v997_v32 = vadd.f32 %v3637_v9, %v996_v22  ;;  %v1253_v33 = vadd.f32 %v3637_v9, %v1252_v23 }
 0x1b2   : > { %v1008_v28 = vadd.f32 %v2956_v24, %v3637_v9  ;;  %v1264_v29 = vadd.f32 %v3020_v25, %v3637_v9  ;;  %v999_v30 = vpop.f32.mrb[43].mxu0  ;;  %v1255_v31 = vpop.f32.mrb[43].mxu1 }
 0x1b3   : > { %v1000_v34 = vadd.f32 %v3637_v9, %v999_v30  ;;  %v1256_v35 = vadd.f32 %v3637_v9, %v1255_v31 }
 0x1b4   : > { %v2550_v36 = vpack.c.bf16 %v1008_v28, %v1005_v26  ;;  %v2710_v37 = vpack.c.bf16 %v1264_v29, %v1261_v27 }
 0x1b5   : > { %v2545_v38 = vpack.c.bf16 %v1000_v34, %v997_v32  ;;  %v2705_v39 = vpack.c.bf16 %v1256_v35, %v1253_v33 }
 0x1b6   : > { %2782 = vst [vmem:[%s3649_s18 + $0xa8] sm:$0xff] %v2550_v36   ;;  %2814 = vst [vmem:[%s3649_s18 + $0x1a8] sm:$0xff] %v2710_v37  }
 0x1b7   : > { %2781 = vst [vmem:[%s3649_s18 + $0xa0] sm:$0xff] %v2545_v38   ;;  %2813 = vst [vmem:[%s3649_s18 + $0x1a0] sm:$0xff] %v2705_v39   ;;  %v2959_v40 = vpop.f32.mrb[44].mxu0  ;;  %v3023_v41 = vpop.f32.mrb[44].mxu1 }
 0x1b8   : > { %v1012_v42 = vpop.f32.mrb[45].mxu0  ;;  %v1268_v43 = vpop.f32.mrb[45].mxu1  ;;  %v1021_v46 = vadd.f32 %v2959_v40, %v3637_v9  ;;  %v1277_v47 = vadd.f32 %v3023_v41, %v3637_v9 }
 0x1b9   : > { %v2960_v44 = vpop.f32.mrb[46].mxu0  ;;  %v3024_v45 = vpop.f32.mrb[46].mxu1  ;;  %v1013_v52 = vadd.f32 %v3637_v9, %v1012_v42  ;;  %v1269_v53 = vadd.f32 %v3637_v9, %v1268_v43 }
 0x1ba   : > { %v1024_v48 = vadd.f32 %v2960_v44, %v3637_v9  ;;  %v1280_v49 = vadd.f32 %v3024_v45, %v3637_v9  ;;  %v1015_v50 = vpop.f32.mrb[47].mxu0  ;;  %v1271_v51 = vpop.f32.mrb[47].mxu1 }
 0x1bb   : > { %v1016_v54 = vadd.f32 %v3637_v9, %v1015_v50  ;;  %v1272_v55 = vadd.f32 %v3637_v9, %v1271_v51 }
 0x1bc   : > { %v2560_v56 = vpack.c.bf16 %v1024_v48, %v1021_v46  ;;  %v2720_v57 = vpack.c.bf16 %v1280_v49, %v1277_v47 }
 0x1bd   : > { %v2555_v58 = vpack.c.bf16 %v1016_v54, %v1013_v52  ;;  %v2715_v59 = vpack.c.bf16 %v1272_v55, %v1269_v53 }
 0x1be   : > { %2784 = vst [vmem:[%s3649_s18 + $0xb8] sm:$0xff] %v2560_v56   ;;  %2816 = vst [vmem:[%s3649_s18 + $0x1b8] sm:$0xff] %v2720_v57  }
 0x1bf   : > { %2783 = vst [vmem:[%s3649_s18 + $0xb0] sm:$0xff] %v2555_v58   ;;  %2815 = vst [vmem:[%s3649_s18 + $0x1b0] sm:$0xff] %v2715_v59   ;;  %v2963_v60 = vpop.f32.mrb[48].mxu0  ;;  %v3027_v61 = vpop.f32.mrb[48].mxu1 }
 0x1c0   : > { %v1028_v62 = vpop.f32.mrb[49].mxu0  ;;  %v1284_v63 = vpop.f32.mrb[49].mxu1  ;;  %v1037_v2 = vadd.f32 %v2963_v60, %v3637_v9  ;;  %v1293_v3 = vadd.f32 %v3027_v61, %v3637_v9 }
 0x1c1   : > { %v2964_v0 = vpop.f32.mrb[50].mxu0  ;;  %v3028_v1 = vpop.f32.mrb[50].mxu1  ;;  %v1029_v8 = vadd.f32 %v3637_v9, %v1028_v62  ;;  %v1285_v10 = vadd.f32 %v3637_v9, %v1284_v63 }
 0x1c2   : > { %v1040_v4 = vadd.f32 %v2964_v0, %v3637_v9  ;;  %v1296_v5 = vadd.f32 %v3028_v1, %v3637_v9  ;;  %v1031_v6 = vpop.f32.mrb[51].mxu0  ;;  %v1287_v7 = vpop.f32.mrb[51].mxu1 }
 0x1c3   : > { %v1032_v11 = vadd.f32 %v3637_v9, %v1031_v6  ;;  %v1288_v12 = vadd.f32 %v3637_v9, %v1287_v7 }
 0x1c4   : > { %v2570_v13 = vpack.c.bf16 %v1040_v4, %v1037_v2  ;;  %v2730_v14 = vpack.c.bf16 %v1296_v5, %v1293_v3 }
 0x1c5   : > { %v2565_v15 = vpack.c.bf16 %v1032_v11, %v1029_v8  ;;  %v2725_v16 = vpack.c.bf16 %v1288_v12, %v1285_v10 }
 0x1c6   : > { %2786 = vst [vmem:[%s3649_s18 + $0xc8] sm:$0xff] %v2570_v13   ;;  %2818 = vst [vmem:[%s3649_s18 + $0x1c8] sm:$0xff] %v2730_v14  }
 0x1c7   : > { %2785 = vst [vmem:[%s3649_s18 + $0xc0] sm:$0xff] %v2565_v15   ;;  %2817 = vst [vmem:[%s3649_s18 + $0x1c0] sm:$0xff] %v2725_v16   ;;  %v2967_v17 = vpop.f32.mrb[52].mxu0  ;;  %v3031_v18 = vpop.f32.mrb[52].mxu1 }
 0x1c8   : > { %v1044_v19 = vpop.f32.mrb[53].mxu0  ;;  %v1300_v20 = vpop.f32.mrb[53].mxu1  ;;  %v1053_v23 = vadd.f32 %v2967_v17, %v3637_v9  ;;  %v1309_v24 = vadd.f32 %v3031_v18, %v3637_v9 }
 0x1c9   : > { %v2968_v21 = vpop.f32.mrb[54].mxu0  ;;  %v3032_v22 = vpop.f32.mrb[54].mxu1  ;;  %v1045_v29 = vadd.f32 %v3637_v9, %v1044_v19  ;;  %v1301_v30 = vadd.f32 %v3637_v9, %v1300_v20 }
 0x1ca   : > { %v1056_v25 = vadd.f32 %v2968_v21, %v3637_v9  ;;  %v1312_v26 = vadd.f32 %v3032_v22, %v3637_v9  ;;  %v1047_v27 = vpop.f32.mrb[55].mxu0  ;;  %v1303_v28 = vpop.f32.mrb[55].mxu1 }
 0x1cb   : > { %v1048_v31 = vadd.f32 %v3637_v9, %v1047_v27  ;;  %v1304_v32 = vadd.f32 %v3637_v9, %v1303_v28 }
 0x1cc   : > { %v2580_v33 = vpack.c.bf16 %v1056_v25, %v1053_v23  ;;  %v2740_v34 = vpack.c.bf16 %v1312_v26, %v1309_v24 }
 0x1cd   : > { %v2575_v35 = vpack.c.bf16 %v1048_v31, %v1045_v29  ;;  %v2735_v36 = vpack.c.bf16 %v1304_v32, %v1301_v30 }
 0x1ce   : > { %2788 = vst [vmem:[%s3649_s18 + $0xd8] sm:$0xff] %v2580_v33   ;;  %2820 = vst [vmem:[%s3649_s18 + $0x1d8] sm:$0xff] %v2740_v34  }
 0x1cf   : > { %2787 = vst [vmem:[%s3649_s18 + $0xd0] sm:$0xff] %v2575_v35   ;;  %2819 = vst [vmem:[%s3649_s18 + $0x1d0] sm:$0xff] %v2735_v36   ;;  %v2971_v37 = vpop.f32.mrb[56].mxu0  ;;  %v3035_v38 = vpop.f32.mrb[56].mxu1 }
 0x1d0   : > { %v1060_v39 = vpop.f32.mrb[57].mxu0  ;;  %v1316_v40 = vpop.f32.mrb[57].mxu1  ;;  %v1069_v43 = vadd.f32 %v2971_v37, %v3637_v9  ;;  %v1325_v44 = vadd.f32 %v3035_v38, %v3637_v9 }
 0x1d1   : > { %v2972_v41 = vpop.f32.mrb[58].mxu0  ;;  %v3036_v42 = vpop.f32.mrb[58].mxu1  ;;  %v1061_v49 = vadd.f32 %v3637_v9, %v1060_v39  ;;  %v1317_v50 = vadd.f32 %v3637_v9, %v1316_v40 }
 0x1d2   : > { %v1072_v45 = vadd.f32 %v2972_v41, %v3637_v9  ;;  %v1328_v46 = vadd.f32 %v3036_v42, %v3637_v9  ;;  %v1063_v47 = vpop.f32.mrb[59].mxu0  ;;  %v1319_v48 = vpop.f32.mrb[59].mxu1 }
 0x1d3   : > { %v1064_v51 = vadd.f32 %v3637_v9, %v1063_v47  ;;  %v1320_v52 = vadd.f32 %v3637_v9, %v1319_v48 }
 0x1d4   : > { %v2590_v53 = vpack.c.bf16 %v1072_v45, %v1069_v43  ;;  %v2750_v54 = vpack.c.bf16 %v1328_v46, %v1325_v44 }
 0x1d5   : > { %v2585_v55 = vpack.c.bf16 %v1064_v51, %v1061_v49  ;;  %v2745_v56 = vpack.c.bf16 %v1320_v52, %v1317_v50 }
 0x1d6   : > { %2790 = vst [vmem:[%s3649_s18 + $0xe8] sm:$0xff] %v2590_v53   ;;  %2822 = vst [vmem:[%s3649_s18 + $0x1e8] sm:$0xff] %v2750_v54  }
 0x1d7   : > { %2789 = vst [vmem:[%s3649_s18 + $0xe0] sm:$0xff] %v2585_v55   ;;  %2821 = vst [vmem:[%s3649_s18 + $0x1e0] sm:$0xff] %v2745_v56   ;;  %v2975_v57 = vpop.f32.mrb[60].mxu0  ;;  %v3039_v58 = vpop.f32.mrb[60].mxu1 }
 0x1d8   : > { %v1076_v59 = vpop.f32.mrb[61].mxu0  ;;  %v1332_v60 = vpop.f32.mrb[61].mxu1  ;;  %v1085_v63 = vadd.f32 %v2975_v57, %v3637_v9  ;;  %v1341_v0 = vadd.f32 %v3039_v58, %v3637_v9 }
 0x1d9   : > { %v2976_v61 = vpop.f32.mrb[62].mxu0  ;;  %v3040_v62 = vpop.f32.mrb[62].mxu1  ;;  %v1077_v5 = vadd.f32 %v3637_v9, %v1076_v59  ;;  %v1333_v6 = vadd.f32 %v3637_v9, %v1332_v60 }
 0x1da   : > { %v1088_v1 = vadd.f32 %v2976_v61, %v3637_v9  ;;  %v1344_v2 = vadd.f32 %v3040_v62, %v3637_v9  ;;  %v1079_v3 = vpop.f32.mrb[63].mxu0  ;;  %v1335_v4 = vpop.f32.mrb[63].mxu1 }
 0x1db   : > { %v1080_v7 = vadd.f32 %v3637_v9, %v1079_v3  ;;  %v1336_v8 = vadd.f32 %v3637_v9, %v1335_v4 }
 0x1dc   : > { %v2600_v10 = vpack.c.bf16 %v1088_v1, %v1085_v63  ;;  %v2760_v11 = vpack.c.bf16 %v1344_v2, %v1341_v0 }
 0x1dd   : > { %v2595_v12 = vpack.c.bf16 %v1080_v7, %v1077_v5  ;;  %v2755_v13 = vpack.c.bf16 %v1336_v8, %v1333_v6 }
 0x1de   : > { %2792 = vst [vmem:[%s3649_s18 + $0xf8] sm:$0xff] %v2600_v10   ;;  %2824 = vst [vmem:[%s3649_s18 + $0x1f8] sm:$0xff] %v2760_v11  }
 0x1df   : > { %2791 = vst [vmem:[%s3649_s18 + $0xf0] sm:$0xff] %v2595_v12   ;;  %2823 = vst [vmem:[%s3649_s18 + $0x1f0] sm:$0xff] %v2755_v13  }
 0x1e0   : > { %3299 = shalt.err (!%p3296_p7)
}
 0x1e1   : > { %s3300_s11 = scalar_lea.hbm %s3836_s26, 8192  ;;  %s3304_s27 = scalar_lea.hbm %s3888_s3, 65536 }
 0x1e2   : > { %p3301_p9 = scmp.ne.s32.totalorder %s3836_s26, %s3300_s11  ;;  %p3305_p5 = scmp.lt.u32.totalorder %s3836_s26, %s3888_s3 }
 0x1e3   : > { %p3306_p10 = scmp.lt.u32.totalorder %s3304_s27, %s3300_s11  ;;  %p3308_p2 = scmp.lt.u32.totalorder %s3300_s11, %s3836_s26 }
 0x1e4   : > { %p3302_p12 = pnand %p3301_p9, %p3502_p6 }
 0x1e5   : > { %p3307_p1 = por %p3306_p10, %p3305_p5 }
 0x1e6   : > { %p3303_p0 = pneg %p3302_p12 }
 0x1e7   : > { %p3309_p4 = por %p3308_p2, %p3307_p1 }
 0x1e9   : > { %p3310_p8 = pnand %p3309_p4, %p3303_p0 }
 0x1eb   : > { %3313 = shalt.err (!%p3310_p8)
}
 0x1ec   : > { %s3364_s22 = smov 64   ;;  %s3365_s18 = smov 4  }
 0x1ed   : > { %3067 = dma.vmem_to_hbm [thread:$0]  (%p3502_p6), %s3838_s7, 8192, %s3836_s26, %s1988_s28, %s3364_s22, %s3364_s22, %s3365_s18  }
 0x1ee PF: > { %p3089_p11 = scmp.ge.s32.totalorder %s3356_s15, 2  ;;  %s2016_s20 = sand.u32 1, %s3344_s12  }
 0x1ef   : > { %p3903_p13 = scmp.ne.s32.totalorder %s3893_s19, 0  ;;  %s2017_s16 = scalar_lea.sflag [#allocation4], %s2016_s20 }
 0x1f1   : > { %p3081_p3 = pnand %p3089_p11, %p3903_p13 }
 0x1f3   : > { %3339 = dma.done.wait (!%p3081_p3), %s2017_s16, 8192  }
 0x1f4   : > { %3341 = vsyncadd (!%p3081_p3), %s2017_s16, 4294959104  ;;  %p17_p7 = scmp.ge.s32.totalorder %s3492_s5, 10   ;;  %s3904_s12 = smov %s3348_s13 }
 0x1f5   : > { %s3905_s13 = smov %s3352_s14  ;;  %s3906_s14 = smov %s3508_s10 }
 0x1f6   : > { %s3907_s15 = smov %s3492_s5  ;;  %19 = sbr.rel (!%p17_p7) target bundleno = 6 (0x6), region = 85 }
 0x1fd   :  { %2022 = vsyncpa [#allocation3], 1 }
 0x1fe   :  { %2024 = vsyncpa [#allocation3 + $0x1], 1 }
 0x1ff   :  { %2025 = vsyncpa [#allocation6], 1 }
 0x200   :  { %2026 = vsyncpa [#allocation4], 1 }
 0x201   :  { %2028 = vsyncpa [#allocation4 + $0x1], 1 }

</bundles_post_ra>
